<compile_context>
chip_gen: v5e
topology: v5e:2x2
jax: 0.10.0
libtpu: 0.0.40
codegen_flags: <defaults>
</compile_context>

<pallas_src>
import functools

import jax
import jax.numpy as jnp
from jax.experimental import pallas as pl
from jax.experimental.pallas import tpu as pltpu


# ----------------------------------------------------------------------------
# Fused kernel: per-plane Encoder_Feature_Linear + OCD MLP head accumulator
# ----------------------------------------------------------------------------
def _encoder_ocd_kernel(x_ref, w1_ref, b1_ref, w2_ref, b2_ref,
                        ow1_ref, ob1_ref, ow2_ref, ob2_ref, ow3_ref,
                        out_ref, acc_ref):
    # x_ref:  (PB, B, D)     PB planes' activations             (bf16)
    # w1_ref: (PB, D, H1p)   feature linear1 weights (in, out)  (bf16)
    # b1_ref: (PB, 1, H1p)   feature linear1 bias               (f32)
    # w2_ref: (PB, H1p, O)   feature linear2 weights            (bf16)
    # b2_ref: (PB, 1, O)     feature linear2 bias               (f32)
    # ow1_ref:(PB, O, D1)    ocd_linear1 weight rows for block  (bf16)
    # ob1/ow2/ob2/ow3: head bias / weights (full arrays, bf16 weights/f32 bias)
    # out_ref:(B, D3)        final output (f32)
    # acc_ref:(B, D1)        f32 accumulator for flat @ ocd_w1
    @pl.when(pl.program_id(0) == 0)
    def _init():
        acc_ref[...] = jnp.zeros_like(acc_ref)

    x = x_ref[...]                                              # (PB, B, D) bf16
    h = jnp.einsum("pbd,pdh->pbh", x, w1_ref[...],
                   preferred_element_type=jnp.float32)          # (PB, B, H1p) f32
    h = jnp.maximum(h + b1_ref[...], 0.0)                       # ReLU

    f = jnp.einsum("pbh,pho->pbo", h.astype(jnp.bfloat16), w2_ref[...],
                   preferred_element_type=jnp.float32)          # (PB, B, O) f32
    f = jnp.maximum(f + b2_ref[...], 0.0)                       # ReLU

    # Head first layer, accumulated over the plane blocks.  Flatten order of
    # torch.cat(dim=1)+Flatten is index p*O + o, which matches ocd_w1
    # reshaped to (P, O, D1).
    contrib = jnp.einsum("pbo,pod->pbd", f.astype(jnp.bfloat16), ow1_ref[...],
                         preferred_element_type=jnp.float32)    # (PB, B, D1)
    acc_ref[...] += jnp.sum(contrib, axis=0)

    @pl.when(pl.program_id(0) == pl.num_programs(0) - 1)
    def _finalize():
        z = jnp.maximum(acc_ref[...] + ob1_ref[...], 0.0)       # ReLU
        z = jnp.dot(z.astype(jnp.bfloat16), ow2_ref[...],
                    preferred_element_type=jnp.float32)
        z = jnp.maximum(z + ob2_ref[...], 0.0)                  # ReLU
        z = jnp.dot(z.astype(jnp.bfloat16), ow3_ref[...],
                    preferred_element_type=jnp.float32)         # no bias
        out_ref[...] = jnp.clip(z, 0.0, 6.0).astype(out_ref.dtype)  # ReLU6


def _choose_pb(p, max_pb=42):
    """Largest divisor of p that is <= max_pb (planes per grid step)."""
    for cand in range(min(p, max_pb), 0, -1):
        if p % cand == 0:
            return cand
    return 1


# ----------------------------------------------------------------------------
# Wrapper
# ----------------------------------------------------------------------------
@functools.partial(jax.jit, static_argnames=("pb",))
def encoder_ocd_forward(x, packed, pb=None):
    """x: (B, D, P) float32 (same axis convention as the PyTorch module)."""
    B, D, P = x.shape
    w1 = packed["feat_w1"]        # (P, D, H1p)   bf16
    b1 = packed["feat_b1"]        # (P, 1, H1p)   f32
    w2 = packed["feat_w2"]        # (P, H1p, O)   bf16
    b2 = packed["feat_b2"]        # (P, 1, O)     f32
    ow1 = packed["ocd_w1"]        # (P, O, D1)    bf16
    ob1 = packed["ocd_b1"]        # (1, D1)       f32
    ow2 = packed["ocd_w2"]        # (D1, D2)      bf16
    ob2 = packed["ocd_b2"]        # (1, D2)       f32
    ow3 = packed["ocd_w3"]        # (D2, D3)      bf16

    H1p = w1.shape[2]
    O = w2.shape[2]
    D1, D2 = ow2.shape
    D3 = ow3.shape[1]

    if pb is None:
        pb = _choose_pb(P)
    assert P % pb == 0, (P, pb)
    nb = P // pb

    # Plane-major, bf16 activations (halves x DMA; matmuls are bf16 x bf16).
    x_pbd = jnp.transpose(x, (2, 0, 1)).astype(jnp.bfloat16)   # (P, B, D)

    out = pl.pallas_call(
        _encoder_ocd_kernel,
        out_shape=jax.ShapeDtypeStruct((B, D3), jnp.float32),
        grid=(nb,),
        in_specs=[
            pl.BlockSpec((pb, B, D), lambda i: (i, 0, 0)),
            pl.BlockSpec((pb, D, H1p), lambda i: (i, 0, 0)),
            pl.BlockSpec((pb, 1, H1p), lambda i: (i, 0, 0)),
            pl.BlockSpec((pb, H1p, O), lambda i: (i, 0, 0)),
            pl.BlockSpec((pb, 1, O), lambda i: (i, 0, 0)),
            pl.BlockSpec((pb, O, D1), lambda i: (i, 0, 0)),
            pl.BlockSpec((1, D1), lambda i: (0, 0)),
            pl.BlockSpec((D1, D2), lambda i: (0, 0)),
            pl.BlockSpec((1, D2), lambda i: (0, 0)),
            pl.BlockSpec((D2, D3), lambda i: (0, 0)),
        ],
        out_specs=pl.BlockSpec((B, D3), lambda i: (0, 0)),
        scratch_shapes=[pltpu.VMEM((B, D1), jnp.float32)],
        compiler_params=pltpu.CompilerParams(
            dimension_semantics=("arbitrary",),   # plane axis carries the acc
            vmem_limit_bytes=32 * 1024 * 1024),
    )(x_pbd, w1, b1, w2, b2, ow1, ob1, ow2, ob2, ow3)
    return out


# ----------------------------------------------------------------------------
# Parameter creation / packing
# ----------------------------------------------------------------------------
def make_params(key, *, inplanes, in_size, out_size, d1, d2, d3):
    """f32 params with Linear weights stored (in, out) (transposed vs torch)."""
    h1 = out_size * 4
    ks = jax.random.split(key, 9)
    sw, sb = 0.1, 0.2
    return {
        "feat_w1": sw * jax.random.normal(ks[0], (inplanes, in_size, h1), jnp.float32),
        "feat_b1": sb * jax.random.normal(ks[1], (inplanes, 1, h1), jnp.float32),
        "feat_w2": sw * jax.random.normal(ks[2], (inplanes, h1, out_size), jnp.float32),
        "feat_b2": sb * jax.random.normal(ks[3], (inplanes, 1, out_size), jnp.float32),
        "ocd_w1": sw * jax.random.normal(ks[4], (inplanes * out_size, d1), jnp.float32),
        "ocd_b1": sb * jax.random.normal(ks[5], (1, d1), jnp.float32),
        "ocd_w2": sw * jax.random.normal(ks[6], (d1, d2), jnp.float32),
        "ocd_b2": sb * jax.random.normal(ks[7], (1, d2), jnp.float32),
        "ocd_w3": sw * jax.random.normal(ks[8], (d2, d3), jnp.float32),
    }


def pack_params(params, *, h1_multiple=8, weight_dtype=jnp.bfloat16):
    """Pad H1 to a small sublane-friendly multiple (44 -> 48, not 64: the w1
    stream dominates HBM traffic), cast weights to bf16, and reshape ocd_w1 to
    (P, O, D1) so the fused kernel can slice it per plane block."""
    w1 = params["feat_w1"]           # (P, D, H1)
    b1 = params["feat_b1"]           # (P, 1, H1)
    w2 = params["feat_w2"]           # (P, H1, O)
    P, _, H1 = w1.shape
    O = w2.shape[2]
    H1p = -(-H1 // h1_multiple) * h1_multiple
    pad = H1p - H1
    w1p = jnp.pad(w1, ((0, 0), (0, 0), (0, pad)))
    b1p = jnp.pad(b1, ((0, 0), (0, 0), (0, pad)))
    w2p = jnp.pad(w2, ((0, 0), (0, pad), (0, 0)))
    ow1 = params["ocd_w1"]           # (P*O, D1)
    D1 = ow1.shape[1]
    return {
        "feat_w1": w1p.astype(weight_dtype),
        "feat_b1": b1p.astype(jnp.float32),
        "feat_w2": w2p.astype(weight_dtype),
        "feat_b2": params["feat_b2"].astype(jnp.float32),
        "ocd_w1": ow1.reshape(P, O, D1).astype(weight_dtype),
        "ocd_b1": params["ocd_b1"].astype(jnp.float32),
        "ocd_w2": params["ocd_w2"].astype(weight_dtype),
        "ocd_b2": params["ocd_b2"].astype(jnp.float32),
        "ocd_w3": params["ocd_w3"].astype(weight_dtype),
    }


# ----------------------------------------------------------------------------
# Pure-JAX reference (mirrors the PyTorch forward; both matmul operands are
# quantized to bf16 exactly like the kernel so the comparison is
# apples-to-apples, with f32 accumulation).
# ----------------------------------------------------------------------------
def encoder_ocd_reference(x, params, op_dtype=jnp.bfloat16):
    def mm(a, w):
        return jnp.dot(a.astype(op_dtype), w.astype(op_dtype),
                       preferred_element_type=jnp.float32)

    B, D, P = x.shape
    feats = []
    for i in range(P):
        xi = x[:, :, i]                                            # (B, D)
        h = jnp.maximum(mm(xi, params["feat_w1"][i]) + params["feat_b1"][i, 0], 0.0)
        f = jnp.maximum(mm(h, params["feat_w2"][i]) + params["feat_b2"][i, 0], 0.0)
        feats.append(f[:, None, :])                                # unsqueeze dim=1
    z = jnp.concatenate(feats, axis=1).reshape(B, -1)              # cat + flatten
    z = jnp.maximum(mm(z, params["ocd_w1"]) + params["ocd_b1"][0], 0.0)
    z = jnp.maximum(mm(z, params["ocd_w2"]) + params["ocd_b2"][0], 0.0)
    z = mm(z, params["ocd_w3"])
    return jnp.clip(z, 0.0, 6.0)                                   # ReLU6


if __name__ == "__main__":
    # Small config structurally identical to Encoder_OCD(inplanes=84) with
    # in_size=512, out_size=11, dims=[924, 512, 256, 6]; in_size and the head
    # dims are reduced for a quick demo run.  P=84 with the default pb=42
    # gives a 2-step grid, exercising the fused plane-loop accumulator.
    B, INPLANES, IN_SIZE, OUT_SIZE = 2, 84, 64, 11
    D1, D2, D3 = 128, 64, 6

    key = jax.random.PRNGKey(0)
    kx, kp = jax.random.split(key)
    x = jax.random.normal(kx, (B, IN_SIZE, INPLANES), jnp.float32)
    params = make_params(kp, inplanes=INPLANES, in_size=IN_SIZE,
                         out_size=OUT_SIZE, d1=D1, d2=D2, d3=D3)
    packed = pack_params(params)

    out = encoder_ocd_forward(x, packed)          # default pb -> 42, 2 steps
    out = jax.block_until_ready(out)

    ref = encoder_ocd_reference(x, params)
    assert out.shape == (B, D3), out.shape
    assert float(jnp.max(out)) > 0.0, "degenerate all-zero output"
    max_diff = float(jnp.max(jnp.abs(out - ref)))
    assert jnp.allclose(out, ref, atol=1e-2, rtol=1e-2), f"max abs diff {max_diff}"

    print("KERNEL_OK")
</pallas_src>

<mosaic_0001>
module attributes {stable_mosaic.version = 11 : i64} {
  func.func @_encoder_ocd_kernel(%arg0: i32, %arg1: memref<42x2x64xbf16, #tpu.memory_space<vmem>>, %arg2: memref<42x64x48xbf16, #tpu.memory_space<vmem>>, %arg3: memref<42x1x48xf32, #tpu.memory_space<vmem>>, %arg4: memref<42x48x11xbf16, #tpu.memory_space<vmem>>, %arg5: memref<42x1x11xf32, #tpu.memory_space<vmem>>, %arg6: memref<42x11x128xbf16, #tpu.memory_space<vmem>>, %arg7: memref<1x128xf32, #tpu.memory_space<vmem>>, %arg8: memref<128x64xbf16, #tpu.memory_space<vmem>>, %arg9: memref<1x64xf32, #tpu.memory_space<vmem>>, %arg10: memref<64x6xbf16, #tpu.memory_space<vmem>>, %arg11: memref<2x6xf32, #tpu.memory_space<vmem>>, %arg12: memref<2x128xf32, #tpu.memory_space<vmem>>) attributes {dimension_semantics = [#tpu.dimension_semantics<arbitrary>], iteration_bounds = array<i64: 2>, scalar_prefetch = 0 : i64, scratch_operands = 1 : i64, tpu.core_type = #tpu.core_type<tc>, window_params = [{transform_indices = @transform_0, window_bounds = array<i64: 42, 2, 64>}, {transform_indices = @transform_1, window_bounds = array<i64: 42, 64, 48>}, {transform_indices = @transform_2, window_bounds = array<i64: 42, 1, 48>}, {transform_indices = @transform_3, window_bounds = array<i64: 42, 48, 11>}, {transform_indices = @transform_4, window_bounds = array<i64: 42, 1, 11>}, {transform_indices = @transform_5, window_bounds = array<i64: 42, 11, 128>}, {pipeline_mode = #tpu.pipeline_mode<synchronous>, transform_indices = @transform_6, window_bounds = array<i64: 1, 128>}, {pipeline_mode = #tpu.pipeline_mode<synchronous>, transform_indices = @transform_7, window_bounds = array<i64: 128, 64>}, {pipeline_mode = #tpu.pipeline_mode<synchronous>, transform_indices = @transform_8, window_bounds = array<i64: 1, 64>}, {pipeline_mode = #tpu.pipeline_mode<synchronous>, transform_indices = @transform_9, window_bounds = array<i64: 64, 6>}, {pipeline_mode = #tpu.pipeline_mode<synchronous>, transform_indices = @transform_10, window_bounds = array<i64: 2, 6>}]} {
    %c0_i32 = arith.constant 0 : i32
    %0 = arith.cmpi eq, %arg0, %c0_i32 : i32
    %1 = arith.extui %0 : i1 to i32
    %c0_i32_0 = arith.constant 0 : i32
    %2 = arith.cmpi ne, %1, %c0_i32_0 : i32
    scf.if %2 {
      %cst_28 = arith.constant 0.000000e+00 : f32
      %29 = vector.broadcast %cst_28 : f32 to vector<2x128xf32>
      %c0_29 = arith.constant 0 : index
      %c0_30 = arith.constant 0 : index
      %30 = vector.load %arg12[%c0_29, %c0_30] : memref<2x128xf32, #tpu.memory_space<vmem>>, vector<2x128xf32>
      tpu.vector_store %arg12[%c0_29, %c0_30], %29 {strides = array<i32>} : memref<2x128xf32, #tpu.memory_space<vmem>>, vector<2x128xf32>,
    } else {
    }
    %c0 = arith.constant 0 : index
    %c0_1 = arith.constant 0 : index
    %c0_2 = arith.constant 0 : index
    %3 = vector.load %arg1[%c0, %c0_1, %c0_2] : memref<42x2x64xbf16, #tpu.memory_space<vmem>>, vector<42x2x64xbf16>
    %c0_3 = arith.constant 0 : index
    %c0_4 = arith.constant 0 : index
    %c0_5 = arith.constant 0 : index
    %4 = vector.load %arg2[%c0_3, %c0_4, %c0_5] : memref<42x64x48xbf16, #tpu.memory_space<vmem>>, vector<42x64x48xbf16>
    "tpu.trace_start"() <{level = 10 : i32, message = "pbd,pdh->pbh"}> : () -> ()
    %cst = arith.constant dense<0.000000e+00> : vector<42x2x48xf32>
    %5 = tpu.matmul %3, %4, %cst {dimension_numbers = #tpu.dot_dimension_numbers<[2], [1], [1], [2], [0, 0, 0, 1, 1, 2], [0], [0]>} : vector<42x2x64xbf16>, vector<42x64x48xbf16>, vector<42x2x48xf32> -> vector<42x2x48xf32>
    "tpu.trace_stop"() : () -> ()
    %c0_6 = arith.constant 0 : index
    %c0_7 = arith.constant 0 : index
    %c0_8 = arith.constant 0 : index
    %6 = vector.load %arg3[%c0_6, %c0_7, %c0_8] : memref<42x1x48xf32, #tpu.memory_space<vmem>>, vector<42x1x48xf32>
    %7 = vector.broadcast %6 : vector<42x1x48xf32> to vector<42x2x48xf32>
    %8 = arith.addf %5, %7 : vector<42x2x48xf32>
    %cst_9 = arith.constant 0.000000e+00 : f32
    %9 = vector.broadcast %cst_9 : f32 to vector<42x2x48xf32>
    %10 = arith.maximumf %8, %9 : vector<42x2x48xf32>
    %11 = arith.truncf %10 : vector<42x2x48xf32> to vector<42x2x48xbf16>
    %c0_10 = arith.constant 0 : index
    %c0_11 = arith.constant 0 : index
    %c0_12 = arith.constant 0 : index
    %12 = vector.load %arg4[%c0_10, %c0_11, %c0_12] : memref<42x48x11xbf16, #tpu.memory_space<vmem>>, vector<42x48x11xbf16>
    "tpu.trace_start"() <{level = 10 : i32, message = "pbh,pho->pbo"}> : () -> ()
    %cst_13 = arith.constant dense<0.000000e+00> : vector<42x2x11xf32>
    %13 = tpu.matmul %11, %12, %cst_13 {dimension_numbers = #tpu.dot_dimension_numbers<[2], [1], [1], [2], [0, 0, 0, 1, 1, 2], [0], [0]>} : vector<42x2x48xbf16>, vector<42x48x11xbf16>, vector<42x2x11xf32> -> vector<42x2x11xf32>
    "tpu.trace_stop"() : () -> ()
    %c0_14 = arith.constant 0 : index
    %c0_15 = arith.constant 0 : index
    %c0_16 = arith.constant 0 : index
    %14 = vector.load %arg5[%c0_14, %c0_15, %c0_16] : memref<42x1x11xf32, #tpu.memory_space<vmem>>, vector<42x1x11xf32>
    %15 = vector.broadcast %14 : vector<42x1x11xf32> to vector<42x2x11xf32>
    %16 = arith.addf %13, %15 : vector<42x2x11xf32>
    %cst_17 = arith.constant 0.000000e+00 : f32
    %17 = vector.broadcast %cst_17 : f32 to vector<42x2x11xf32>
    %18 = arith.maximumf %16, %17 : vector<42x2x11xf32>
    %19 = arith.truncf %18 : vector<42x2x11xf32> to vector<42x2x11xbf16>
    %c0_18 = arith.constant 0 : index
    %c0_19 = arith.constant 0 : index
    %c0_20 = arith.constant 0 : index
    %20 = vector.load %arg6[%c0_18, %c0_19, %c0_20] : memref<42x11x128xbf16, #tpu.memory_space<vmem>>, vector<42x11x128xbf16>
    "tpu.trace_start"() <{level = 10 : i32, message = "pbo,pod->pbd"}> : () -> ()
    %cst_21 = arith.constant dense<0.000000e+00> : vector<42x2x128xf32>
    %21 = tpu.matmul %19, %20, %cst_21 {dimension_numbers = #tpu.dot_dimension_numbers<[2], [1], [1], [2], [0, 0, 0, 1, 1, 2], [0], [0]>} : vector<42x2x11xbf16>, vector<42x11x128xbf16>, vector<42x2x128xf32> -> vector<42x2x128xf32>
    "tpu.trace_stop"() : () -> ()
    %c0_22 = arith.constant 0 : index
    %c0_23 = arith.constant 0 : index
    %22 = vector.load %arg12[%c0_22, %c0_23] : memref<2x128xf32, #tpu.memory_space<vmem>>, vector<2x128xf32>
    %cst_24 = arith.constant dense<0.000000e+00> : vector<2x128xf32>
    %23 = vector.multi_reduction <add>, %21, %cst_24 [0] : vector<42x2x128xf32> to vector<2x128xf32>
    %24 = arith.addf %22, %23 : vector<2x128xf32>
    %c0_25 = arith.constant 0 : index
    %c0_26 = arith.constant 0 : index
    %25 = vector.load %arg12[%c0_25, %c0_26] : memref<2x128xf32, #tpu.memory_space<vmem>>, vector<2x128xf32>
    tpu.vector_store %arg12[%c0_25, %c0_26], %24 {strides = array<i32>} : memref<2x128xf32, #tpu.memory_space<vmem>>, vector<2x128xf32>,
    %c1_i32 = arith.constant 1 : i32
    %26 = arith.cmpi eq, %arg0, %c1_i32 : i32
    %27 = arith.extui %26 : i1 to i32
    %c0_i32_27 = arith.constant 0 : i32
    %28 = arith.cmpi ne, %27, %c0_i32_27 : i32
    scf.if %28 {
      %c0_28 = arith.constant 0 : index
      %c0_29 = arith.constant 0 : index
      %29 = vector.load %arg12[%c0_28, %c0_29] : memref<2x128xf32, #tpu.memory_space<vmem>>, vector<2x128xf32>
      %c0_30 = arith.constant 0 : index
      %c0_31 = arith.constant 0 : index
      %30 = vector.load %arg7[%c0_30, %c0_31] : memref<1x128xf32, #tpu.memory_space<vmem>>, vector<1x128xf32>
      %31 = vector.broadcast %30 : vector<1x128xf32> to vector<2x128xf32>
      %32 = arith.addf %29, %31 : vector<2x128xf32>
      %cst_32 = arith.constant 0.000000e+00 : f32
      %33 = vector.broadcast %cst_32 : f32 to vector<2x128xf32>
      %34 = arith.maximumf %32, %33 : vector<2x128xf32>
      %35 = arith.truncf %34 : vector<2x128xf32> to vector<2x128xbf16>
      %c0_33 = arith.constant 0 : index
      %c0_34 = arith.constant 0 : index
      %36 = vector.load %arg8[%c0_33, %c0_34] : memref<128x64xbf16, #tpu.memory_space<vmem>>, vector<128x64xbf16>
      %cst_35 = arith.constant dense<0.000000e+00> : vector<2x64xf32>
      %37 = tpu.matmul %35, %36, %cst_35 {dimension_numbers = #tpu.dot_dimension_numbers<[1], [0], [0], [1], [0, 0, 1, 1], [], []>} : vector<2x128xbf16>, vector<128x64xbf16>, vector<2x64xf32> -> vector<2x64xf32>
      %c0_36 = arith.constant 0 : index
      %c0_37 = arith.constant 0 : index
      %38 = vector.load %arg9[%c0_36, %c0_37] : memref<1x64xf32, #tpu.memory_space<vmem>>, vector<1x64xf32>
      %39 = vector.broadcast %38 : vector<1x64xf32> to vector<2x64xf32>
      %40 = arith.addf %37, %39 : vector<2x64xf32>
      %cst_38 = arith.constant 0.000000e+00 : f32
      %41 = vector.broadcast %cst_38 : f32 to vector<2x64xf32>
      %42 = arith.maximumf %40, %41 : vector<2x64xf32>
      %43 = arith.truncf %42 : vector<2x64xf32> to vector<2x64xbf16>
      %c0_39 = arith.constant 0 : index
      %c0_40 = arith.constant 0 : index
      %44 = vector.load %arg10[%c0_39, %c0_40] : memref<64x6xbf16, #tpu.memory_space<vmem>>, vector<64x6xbf16>
      %cst_41 = arith.constant dense<0.000000e+00> : vector<2x6xf32>
      %45 = tpu.matmul %43, %44, %cst_41 {dimension_numbers = #tpu.dot_dimension_numbers<[1], [0], [0], [1], [0, 0, 1, 1], [], []>} : vector<2x64xbf16>, vector<64x6xbf16>, vector<2x6xf32> -> vector<2x6xf32>
      %cst_42 = arith.constant 0.000000e+00 : f32
      %cst_43 = arith.constant 6.000000e+00 : f32
      %46 = vector.broadcast %cst_42 : f32 to vector<2x6xf32>
      %47 = arith.maximumf %46, %45 : vector<2x6xf32>
      %48 = vector.broadcast %cst_43 : f32 to vector<2x6xf32>
      %49 = arith.minimumf %48, %47 : vector<2x6xf32>
      %c0_44 = arith.constant 0 : index
      %c0_45 = arith.constant 0 : index
      %50 = vector.load %arg11[%c0_44, %c0_45] : memref<2x6xf32, #tpu.memory_space<vmem>>, vector<2x6xf32>
      tpu.vector_store %arg11[%c0_44, %c0_45], %49 {strides = array<i32>} : memref<2x6xf32, #tpu.memory_space<vmem>>, vector<2x6xf32>,
    } else {
    }
    return
  }
  func.func @transform_0(%arg0: i32) -> (i32, i32, i32) {
    %c0_i32 = arith.constant 0 : i32
    %c0_i32_0 = arith.constant 0 : i32
    %c0_i32_1 = arith.constant 0 : i32
    return %arg0, %c0_i32, %c0_i32_0 : i32, i32, i32
  }
  func.func @transform_1(%arg0: i32) -> (i32, i32, i32) {
    %c0_i32 = arith.constant 0 : i32
    %c0_i32_0 = arith.constant 0 : i32
    %c0_i32_1 = arith.constant 0 : i32
    return %arg0, %c0_i32, %c0_i32_0 : i32, i32, i32
  }
  func.func @transform_2(%arg0: i32) -> (i32, i32, i32) {
    %c0_i32 = arith.constant 0 : i32
    %c0_i32_0 = arith.constant 0 : i32
    %c0_i32_1 = arith.constant 0 : i32
    return %arg0, %c0_i32, %c0_i32_0 : i32, i32, i32
  }
  func.func @transform_3(%arg0: i32) -> (i32, i32, i32) {
    %c0_i32 = arith.constant 0 : i32
    %c0_i32_0 = arith.constant 0 : i32
    %c0_i32_1 = arith.constant 0 : i32
    return %arg0, %c0_i32, %c0_i32_0 : i32, i32, i32
  }
  func.func @transform_4(%arg0: i32) -> (i32, i32, i32) {
    %c0_i32 = arith.constant 0 : i32
    %c0_i32_0 = arith.constant 0 : i32
    %c0_i32_1 = arith.constant 0 : i32
    return %arg0, %c0_i32, %c0_i32_0 : i32, i32, i32
  }
  func.func @transform_5(%arg0: i32) -> (i32, i32, i32) {
    %c0_i32 = arith.constant 0 : i32
    %c0_i32_0 = arith.constant 0 : i32
    %c0_i32_1 = arith.constant 0 : i32
    return %arg0, %c0_i32, %c0_i32_0 : i32, i32, i32
  }
  func.func @transform_6(%arg0: i32) -> (i32, i32) {
    %c0_i32 = arith.constant 0 : i32
    %c0_i32_0 = arith.constant 0 : i32
    %c0_i32_1 = arith.constant 0 : i32
    return %c0_i32, %c0_i32_0 : i32, i32
  }
  func.func @transform_7(%arg0: i32) -> (i32, i32) {
    %c0_i32 = arith.constant 0 : i32
    %c0_i32_0 = arith.constant 0 : i32
    %c0_i32_1 = arith.constant 0 : i32
    return %c0_i32, %c0_i32_0 : i32, i32
  }
  func.func @transform_8(%arg0: i32) -> (i32, i32) {
    %c0_i32 = arith.constant 0 : i32
    %c0_i32_0 = arith.constant 0 : i32
    %c0_i32_1 = arith.constant 0 : i32
    return %c0_i32, %c0_i32_0 : i32, i32
  }
  func.func @transform_9(%arg0: i32) -> (i32, i32) {
    %c0_i32 = arith.constant 0 : i32
    %c0_i32_0 = arith.constant 0 : i32
    %c0_i32_1 = arith.constant 0 : i32
    return %c0_i32, %c0_i32_0 : i32, i32
  }
  func.func @transform_10(%arg0: i32) -> (i32, i32) {
    %c0_i32 = arith.constant 0 : i32
    %c0_i32_0 = arith.constant 0 : i32
    %c0_i32_1 = arith.constant 0 : i32
    return %c0_i32, %c0_i32_0 : i32, i32
  }
}

</mosaic_0001>

<bundles_post_ra>
// kernel: encoder_ocd_forward.1
= control target key start
LH: loop header
LB: loop body
LE: loop exit
PB: predicated region body
PF: predicated region fallthrough
CT: control target
= control target key end

     0   :  { %15 = vsyncpa [#allocation4], 0  ;;  %s8224_s13 = smov 0   ;;  %s9287_s0 = inlined_call_operand.vmem [shape: bf16[84,2,64], index: 0, kind: input, shape index: {}]   ;;  %s9288_s1 = inlined_call_operand.vmem [shape: bf16[84,64,48], index: 1, kind: input, shape index: {}]   ;;  %s9289_s2 = inlined_call_operand.vmem [shape: f32[84,1,48], index: 2, kind: input, shape index: {}]   ;;  %s9290_s3 = inlined_call_operand.vmem [shape: bf16[84,48,11], index: 3, kind: input, shape index: {}]   ;;  %s9291_s4 = inlined_call_operand.vmem [shape: f32[84,1,11], index: 4, kind: input, shape index: {}]   ;;  %s9292_s5 = inlined_call_operand.vmem [shape: bf16[84,11,128], index: 5, kind: input, shape index: {}]   ;;  %s9293_s6 = inlined_call_operand.vmem [shape: f32[1,128], index: 6, kind: input, shape index: {}]   ;;  %s9294_s7 = inlined_call_operand.vmem [shape: bf16[128,64], index: 7, kind: input, shape index: {}]   ;;  %s9295_s8 = inlined_call_operand.vmem [shape: f32[1,64], index: 8, kind: input, shape index: {}]   ;;  %s9296_s9 = inlined_call_operand.vmem [shape: bf16[64,6], index: 9, kind: input, shape index: {}]   ;;  %s9297_s10 = inlined_call_operand.hbm [shape: f32[2,6], index: 10, kind: output, shape index: {}]  }
   0x1 LB: > { %s8230_s14 = sadd.s32 4294967295, %s8164_s13   ;;  %p6141_p0 = scmp.ge.s32.totalorder %s8164_s13, 1  ;;  %s8164_s13 = sphi %s8224_s13, %s21_s13  }
   0x2   : > { %p364_p1 = scmp.lt.s32.totalorder %s8164_s13, 3 }
   0x4   : > { %p365_p2 = pnand %p6141_p0, %p364_p1 }
   0x5   : > { %s422_s15 = smul.u32 (!%p365_p2), 42, %s8230_s14  ;;  %p6147_p4 = scmp.ne.s32.totalorder (!%p365_p2), %s8230_s14, 0 }
   0x6   : > { %368 = sbr.rel (%p365_p2) target bundleno = 972 (0x3cc), region = 60 }
   0x7   : > { %p423_p3 = scmp.lt.s32.totalorder (!%p365_p2), %s422_s15, 83 }
   0xb   : > { %s9299_s15 = smov (!%p423_p3, %s422_s15), 83 }
   0xc   : > { %s8238_s18 = scalar_lea.vmem %s9287_s0, %s9299_s15  ;;  %s7672_s19 = sshll.u32 %s9299_s15, 5 }
   0xd   : > { %s8243_s22 = scalar_lea.vmem %s9288_s1, %s7672_s19  ;;  %s8248_s25 = scalar_lea.vmem %s9289_s2, %s9299_s15 }
   0xe   : > { %s8022_s26 = smul.u32 24, %s9299_s15  ;;  %s8253_s29 = scalar_lea.vmem %s9291_s4, %s9299_s15 }
   0xf   : > { %s7673_s30 = sshll.u32 %s9299_s15, 3  ;;  %462 = sbr.rel (%p6147_p4) target bundleno = 22 (0x16), region = 64 }
  0x10   : > { %s8258_s16 = scalar_lea.vmem %s9290_s3, %s8022_s26  ;;  %s8263_s20 = scalar_lea.vmem %s9292_s5, %s7673_s30 }
  0x14   : > { %v8166_v0 = vmov 0.0  }
  0x15   : > { %463 = vst [vmem:[#allocation2] sm:$0x3] %v8166_v0 }
  0x16 PF: > { %v7677_v1 = vld [vmem:[%s8243_s22 + $0x18] sm:$0xff]  ;;  %v7676_v5 = vld [vmem:[%s8243_s22 + $0x10] sm:$0xff]  ;;  %v7675_v9 = vld [vmem:[%s8243_s22 + $0x8] sm:$0xff]  ;;  %vm1034_vm0 = vcmask 523264   ;;  %vm3213_vm1 = vcmask 392192   ;;  %vm4801_vm2 = vcmask 1044480  }
  0x17   : > { %v7681_v2 = vld [vmem:[%s8243_s22 + $0x38] sm:$0xff]  ;;  %1042 = vmatpush.bf16.msra.mxu0 %v7677_v1  ;;  %v7680_v6 = vld [vmem:[%s8243_s22 + $0x30] sm:$0xff]  ;;  %v7679_v10 = vld [vmem:[%s8243_s22 + $0x28] sm:$0xff]  ;;  %vm4802_vm3 = vcmask 1045504   ;;  %vm4797_vm4 = vcmask 89088   ;;  %vm5806_vm5 = vcmask 1041408  }
  0x18   : > { %v7685_v3 = vld [vmem:[%s8243_s22 + $0x58] sm:$0xff]  ;;  %1082 = vmatpush.bf16.msra.mxu1 %v7681_v2  ;;  %v7684_v7 = vld [vmem:[%s8243_s22 + $0x50] sm:$0xff]  ;;  %v7683_v11 = vld [vmem:[%s8243_s22 + $0x48] sm:$0xff]  ;;  %p7618_p5 = scmp.ne.s32.totalorder %s8230_s14, 1 }
  0x19   : > { %v7689_v4 = vld [vmem:[%s8243_s22 + $0x78] sm:$0xff]  ;;  %1122 = vmatpush.bf16.msra.mxu2 %v7685_v3  ;;  %v7688_v8 = vld [vmem:[%s8243_s22 + $0x70] sm:$0xff]  ;;  %v7687_v12 = vld [vmem:[%s8243_s22 + $0x68] sm:$0xff] }
  0x1a   : > { %1162 = vmatpush.bf16.msra.mxu3 %v7689_v4  ;;  %v7674_v13 = vld [vmem:[%s8243_s22] sm:$0xff]  ;;  %v7693_v17 = vld [vmem:[%s8243_s22 + $0x98] sm:$0xff]  ;;  %v7692_v25 = vld [vmem:[%s8243_s22 + $0x90] sm:$0xff] }
  0x1b   : > { %1043 = vmatpush.bf16.msra.mxu0 %v7676_v5  ;;  %v7678_v14 = vld [vmem:[%s8243_s22 + $0x20] sm:$0xff]  ;;  %v7697_v18 = vld [vmem:[%s8243_s22 + $0xb8] sm:$0xff]  ;;  %v7696_v26 = vld [vmem:[%s8243_s22 + $0xb0] sm:$0xff] }
  0x1c   : > { %1083 = vmatpush.bf16.msra.mxu1 %v7680_v6  ;;  %v7682_v15 = vld [vmem:[%s8243_s22 + $0x40] sm:$0xff]  ;;  %v7701_v23 = vld [vmem:[%s8243_s22 + $0xd8] sm:$0xff]  ;;  %v7700_v27 = vld [vmem:[%s8243_s22 + $0xd0] sm:$0xff] }
  0x1d   : > { %1123 = vmatpush.bf16.msra.mxu2 %v7684_v7  ;;  %v7686_v16 = vld [vmem:[%s8243_s22 + $0x60] sm:$0xff]  ;;  %v7705_v24 = vld [vmem:[%s8243_s22 + $0xf8] sm:$0xff]  ;;  %v7704_v28 = vld [vmem:[%s8243_s22 + $0xf0] sm:$0xff] }
  0x1e   : > { %1163 = vmatpush.bf16.msra.mxu3 %v7688_v8  ;;  %v464_v19 = vld [vmem:[%s8238_s18] sm:$0x1]  ;;  %v465_v20 = vld [vmem:[%s8238_s18 + $0x1] sm:$0x1]  ;;  %v466_v21 = vld [vmem:[%s8238_s18 + $0x2] sm:$0x1] }
  0x1f   : > { %1044 = vmatpush.bf16.msra.mxu0 %v7675_v9  ;;  %v467_v22 = vld [vmem:[%s8238_s18 + $0x3] sm:$0x1]  ;;  %v7691_v29 = vld [vmem:[%s8243_s22 + $0x88] sm:$0xff]  ;;  %v7709_v35 = vld [vmem:[%s8243_s22 + $0x118] sm:$0xff] }
  0x20   : > { %1084 = vmatpush.bf16.msra.mxu1 %v7679_v10  ;;  %v7695_v30 = vld [vmem:[%s8243_s22 + $0xa8] sm:$0xff]  ;;  %v7690_v33 = vld [vmem:[%s8243_s22 + $0x80] sm:$0xff]  ;;  %v7713_v36 = vld [vmem:[%s8243_s22 + $0x138] sm:$0xff] }
  0x21   : > { %1124 = vmatpush.bf16.msra.mxu2 %v7683_v11  ;;  %v7699_v31 = vld [vmem:[%s8243_s22 + $0xc8] sm:$0xff]  ;;  %v7694_v34 = vld [vmem:[%s8243_s22 + $0xa0] sm:$0xff]  ;;  %v7717_v41 = vld [vmem:[%s8243_s22 + $0x158] sm:$0xff] }
  0x22   : > { %1164 = vmatpush.bf16.msra.mxu3 %v7687_v12  ;;  %v7703_v32 = vld [vmem:[%s8243_s22 + $0xe8] sm:$0xff]  ;;  %v7698_v37 = vld [vmem:[%s8243_s22 + $0xc0] sm:$0xff]  ;;  %v7721_v42 = vld [vmem:[%s8243_s22 + $0x178] sm:$0xff] }
  0x23   : > { %1045 = vmatpush.bf16.msra.mxu0 %v7674_v13  ;;  %v7702_v38 = vld [vmem:[%s8243_s22 + $0xe0] sm:$0xff]  ;;  %v7708_v45 = vld [vmem:[%s8243_s22 + $0x110] sm:$0xff]  ;;  %v7707_v49 = vld [vmem:[%s8243_s22 + $0x108] sm:$0xff] }
  0x24   : > { %1085 = vmatpush.bf16.msra.mxu1 %v7678_v14  ;;  %v468_v39 = vld [vmem:[%s8238_s18 + $0x4] sm:$0x1]  ;;  %v469_v40 = vld [vmem:[%s8238_s18 + $0x5] sm:$0x1]  ;;  %v470_v43 = vld [vmem:[%s8238_s18 + $0x6] sm:$0x1] }
  0x25   : > { %1125 = vmatpush.bf16.msra.mxu2 %v7682_v15  ;;  %v471_v44 = vld [vmem:[%s8238_s18 + $0x7] sm:$0x1]  ;;  %v7712_v46 = vld [vmem:[%s8243_s22 + $0x130] sm:$0xff]  ;;  %v7711_v50 = vld [vmem:[%s8243_s22 + $0x128] sm:$0xff] }
  0x26   : > { %1165 = vmatpush.bf16.msra.mxu3 %v7686_v16  ;;  %6164 = vmatmul.msk.bf16.vlgmr.msra.gmra.mxu0 %vm1034_vm0, %v464_v19  ;;  %v7716_v47 = vld [vmem:[%s8243_s22 + $0x150] sm:$0xff]  ;;  %v7715_v51 = vld [vmem:[%s8243_s22 + $0x148] sm:$0xff]  ;;  %v7706_v53 = vld [vmem:[%s8243_s22 + $0x100] sm:$0xff] }
  0x27   : > { %1202 = vmatpush.bf16.msrb.mxu0 %v7693_v17  ;;  %6181 = vmatmul.msk.bf16.vlgmr.msra.gmra.mxu1 %vm1034_vm0, %v465_v20  ;;  %v7720_v48 = vld [vmem:[%s8243_s22 + $0x170] sm:$0xff]  ;;  %v7719_v52 = vld [vmem:[%s8243_s22 + $0x168] sm:$0xff]  ;;  %v7710_v54 = vld [vmem:[%s8243_s22 + $0x120] sm:$0xff] }
  0x28   : > { %1242 = vmatpush.bf16.msrb.mxu1 %v7697_v18  ;;  %6198 = vmatmul.msk.bf16.vlgmr.msra.gmra.mxu2 %vm1034_vm0, %v466_v21  ;;  %v7714_v55 = vld [vmem:[%s8243_s22 + $0x140] sm:$0xff]  ;;  %v7725_v57 = vld [vmem:[%s8243_s22 + $0x198] sm:$0xff]  ;;  %v472_v61 = vld [vmem:[%s8238_s18 + $0x8] sm:$0x1] }
  0x29   : > { %6215 = vmatmul.msk.bf16.vlgmr.msra.gmra.mxu3 %vm1034_vm0, %v467_v22  ;;  %1282 = vmatpush.bf16.msrb.mxu2 %v7701_v23  ;;  %v7718_v56 = vld [vmem:[%s8243_s22 + $0x160] sm:$0xff]  ;;  %v7729_v58 = vld [vmem:[%s8243_s22 + $0x1b8] sm:$0xff]  ;;  %v473_v62 = vld [vmem:[%s8238_s18 + $0x9] sm:$0x1] }
  0x2a   : > { %1322 = vmatpush.bf16.msrb.mxu3 %v7705_v24  ;;  %v7733_v59 = vld [vmem:[%s8243_s22 + $0x1d8] sm:$0xff]  ;;  %v474_v63 = vld [vmem:[%s8238_s18 + $0xa] sm:$0x1]  ;;  %v475_v0 = vld [vmem:[%s8238_s18 + $0xb] sm:$0x1] }
  0x2b   : > { %1203 = vmatpush.bf16.msrb.mxu0 %v7692_v25  ;;  %v7737_v60 = vld [vmem:[%s8243_s22 + $0x1f8] sm:$0xff]  ;;  %v7724_v1 = vld [vmem:[%s8243_s22 + $0x190] sm:$0xff]  ;;  %v7723_v5 = vld [vmem:[%s8243_s22 + $0x188] sm:$0xff] }
  0x2c   : > { %1243 = vmatpush.bf16.msrb.mxu1 %v7696_v26  ;;  %v7728_v2 = vld [vmem:[%s8243_s22 + $0x1b0] sm:$0xff]  ;;  %v7727_v6 = vld [vmem:[%s8243_s22 + $0x1a8] sm:$0xff]  ;;  %v7722_v9 = vld [vmem:[%s8243_s22 + $0x180] sm:$0xff] }
  0x2d   : > { %1283 = vmatpush.bf16.msrb.mxu2 %v7700_v27  ;;  %v7732_v3 = vld [vmem:[%s8243_s22 + $0x1d0] sm:$0xff]  ;;  %v7731_v7 = vld [vmem:[%s8243_s22 + $0x1c8] sm:$0xff]  ;;  %v7726_v10 = vld [vmem:[%s8243_s22 + $0x1a0] sm:$0xff] }
  0x2e   : > { %1323 = vmatpush.bf16.msrb.mxu3 %v7704_v28  ;;  %v7736_v4 = vld [vmem:[%s8243_s22 + $0x1f0] sm:$0xff]  ;;  %v7735_v8 = vld [vmem:[%s8243_s22 + $0x1e8] sm:$0xff]  ;;  %v7730_v11 = vld [vmem:[%s8243_s22 + $0x1c0] sm:$0xff] }
  0x2f   : > { %1204 = vmatpush.bf16.msrb.mxu0 %v7691_v29  ;;  %v7734_v12 = vld [vmem:[%s8243_s22 + $0x1e0] sm:$0xff]  ;;  %v7741_v13 = vld [vmem:[%s8243_s22 + $0x218] sm:$0xff]  ;;  %v476_v17 = vld [vmem:[%s8238_s18 + $0xc] sm:$0x1] }
  0x30   : > { %1244 = vmatpush.bf16.msrb.mxu1 %v7695_v30  ;;  %v7745_v14 = vld [vmem:[%s8243_s22 + $0x238] sm:$0xff]  ;;  %v477_v18 = vld [vmem:[%s8238_s18 + $0xd] sm:$0x1]  ;;  %v478_v19 = vld [vmem:[%s8238_s18 + $0xe] sm:$0x1] }
  0x31   : > { %1284 = vmatpush.bf16.msrb.mxu2 %v7699_v31  ;;  %v7749_v15 = vld [vmem:[%s8243_s22 + $0x258] sm:$0xff]  ;;  %v479_v20 = vld [vmem:[%s8238_s18 + $0xf] sm:$0x1]  ;;  %v7740_v21 = vld [vmem:[%s8243_s22 + $0x210] sm:$0xff] }
  0x32   : > { %1324 = vmatpush.bf16.msrb.mxu3 %v7703_v32  ;;  %v7753_v16 = vld [vmem:[%s8243_s22 + $0x278] sm:$0xff]  ;;  %v7744_v22 = vld [vmem:[%s8243_s22 + $0x230] sm:$0xff]  ;;  %v7739_v25 = vld [vmem:[%s8243_s22 + $0x208] sm:$0xff] }
  0x33   : > { %1205 = vmatpush.bf16.msrb.mxu0 %v7690_v33  ;;  %v7748_v23 = vld [vmem:[%s8243_s22 + $0x250] sm:$0xff]  ;;  %v7743_v26 = vld [vmem:[%s8243_s22 + $0x228] sm:$0xff]  ;;  %v7738_v29 = vld [vmem:[%s8243_s22 + $0x200] sm:$0xff] }
  0x34   : > { %1245 = vmatpush.bf16.msrb.mxu1 %v7694_v34  ;;  %v7752_v24 = vld [vmem:[%s8243_s22 + $0x270] sm:$0xff]  ;;  %v7747_v27 = vld [vmem:[%s8243_s22 + $0x248] sm:$0xff]  ;;  %v7742_v30 = vld [vmem:[%s8243_s22 + $0x220] sm:$0xff] }
  0x35   : > { %1285 = vmatpush.bf16.msrb.mxu2 %v7698_v37  ;;  %v7751_v28 = vld [vmem:[%s8243_s22 + $0x268] sm:$0xff]  ;;  %v7746_v31 = vld [vmem:[%s8243_s22 + $0x240] sm:$0xff]  ;;  %v7757_v33 = vld [vmem:[%s8243_s22 + $0x298] sm:$0xff] }
  0x36   : > { %1325 = vmatpush.bf16.msrb.mxu3 %v7702_v38  ;;  %6232 = vmatmul.msk.bf16.vlgmr.msrb.gmra.mxu0 %vm1034_vm0, %v468_v39  ;;  %v7750_v32 = vld [vmem:[%s8243_s22 + $0x260] sm:$0xff]  ;;  %v7761_v34 = vld [vmem:[%s8243_s22 + $0x2b8] sm:$0xff]  ;;  %v480_v37 = vld [vmem:[%s8238_s18 + $0x10] sm:$0x1] }
  0x37   : > { %1362 = vmatpush.bf16.msra.mxu0 %v7709_v35  ;;  %6249 = vmatmul.msk.bf16.vlgmr.msrb.gmra.mxu1 %vm1034_vm0, %v469_v40  ;;  %v7765_v35 = vld [vmem:[%s8243_s22 + $0x2d8] sm:$0xff]  ;;  %v481_v38 = vld [vmem:[%s8238_s18 + $0x11] sm:$0x1]  ;;  %v482_v39 = vld [vmem:[%s8238_s18 + $0x12] sm:$0x1] }
  0x38   : > { %1402 = vmatpush.bf16.msra.mxu1 %v7713_v36  ;;  %6266 = vmatmul.msk.bf16.vlgmr.msrb.gmra.mxu2 %vm1034_vm0, %v470_v43  ;;  %v7769_v36 = vld [vmem:[%s8243_s22 + $0x2f8] sm:$0xff]  ;;  %v483_v40 = vld [vmem:[%s8238_s18 + $0x13] sm:$0x1] }
  0x39   : > { %1442 = vmatpush.bf16.msra.mxu2 %v7717_v41  ;;  %6283 = vmatmul.msk.bf16.vlgmr.msrb.gmra.mxu3 %vm1034_vm0, %v471_v44  ;;  %v7756_v41 = vld [vmem:[%s8243_s22 + $0x290] sm:$0xff] }
  0x3a   : > { %1482 = vmatpush.bf16.msra.mxu3 %v7721_v42  ;;  %v7760_v42 = vld [vmem:[%s8243_s22 + $0x2b0] sm:$0xff] }
  0x3b   : > { %1363 = vmatpush.bf16.msra.mxu0 %v7708_v45  ;;  %v7764_v43 = vld [vmem:[%s8243_s22 + $0x2d0] sm:$0xff]  ;;  %v7755_v45 = vld [vmem:[%s8243_s22 + $0x288] sm:$0xff] }
  0x3c   : > { %1403 = vmatpush.bf16.msra.mxu1 %v7712_v46  ;;  %v7768_v44 = vld [vmem:[%s8243_s22 + $0x2f0] sm:$0xff]  ;;  %v7759_v46 = vld [vmem:[%s8243_s22 + $0x2a8] sm:$0xff] }
  0x3d   : > { %1443 = vmatpush.bf16.msra.mxu2 %v7716_v47  ;;  %v7763_v47 = vld [vmem:[%s8243_s22 + $0x2c8] sm:$0xff] }
  0x3e   : > { %1483 = vmatpush.bf16.msra.mxu3 %v7720_v48  ;;  %v7767_v48 = vld [vmem:[%s8243_s22 + $0x2e8] sm:$0xff] }
  0x3f   : > { %1364 = vmatpush.bf16.msra.mxu0 %v7707_v49  ;;  %v7754_v49 = vld [vmem:[%s8243_s22 + $0x280] sm:$0xff] }
  0x40   : > { %1404 = vmatpush.bf16.msra.mxu1 %v7711_v50  ;;  %v7758_v50 = vld [vmem:[%s8243_s22 + $0x2a0] sm:$0xff] }
  0x41   : > { %1444 = vmatpush.bf16.msra.mxu2 %v7715_v51  ;;  %v7762_v51 = vld [vmem:[%s8243_s22 + $0x2c0] sm:$0xff] }
  0x42   : > { %1484 = vmatpush.bf16.msra.mxu3 %v7719_v52  ;;  %v7766_v52 = vld [vmem:[%s8243_s22 + $0x2e0] sm:$0xff] }
  0x43   : > { %1365 = vmatpush.bf16.msra.mxu0 %v7706_v53  ;;  %v7773_v53 = vld [vmem:[%s8243_s22 + $0x318] sm:$0xff] }
  0x44   : > { %1405 = vmatpush.bf16.msra.mxu1 %v7710_v54  ;;  %v7777_v54 = vld [vmem:[%s8243_s22 + $0x338] sm:$0xff] }
  0x45   : > { %1445 = vmatpush.bf16.msra.mxu2 %v7714_v55  ;;  %v7781_v55 = vld [vmem:[%s8243_s22 + $0x358] sm:$0xff] }
  0x46   : > { %1485 = vmatpush.bf16.msra.mxu3 %v7718_v56  ;;  %6300 = vmatmul.msk.bf16.vlgmr.msra.gmra.mxu0 %vm1034_vm0, %v472_v61  ;;  %v7785_v56 = vld [vmem:[%s8243_s22 + $0x378] sm:$0xff]  ;;  %v7772_v61 = vld [vmem:[%s8243_s22 + $0x310] sm:$0xff] }
  0x47   : > { %1522 = vmatpush.bf16.msrb.mxu0 %v7725_v57  ;;  %6317 = vmatmul.msk.bf16.vlgmr.msra.gmra.mxu1 %vm1034_vm0, %v473_v62  ;;  %v484_v57 = vld [vmem:[%s8238_s18 + $0x14] sm:$0x1] }
  0x48   : > { %1562 = vmatpush.bf16.msrb.mxu1 %v7729_v58  ;;  %6334 = vmatmul.msk.bf16.vlgmr.msra.gmra.mxu2 %vm1034_vm0, %v474_v63  ;;  %v485_v58 = vld [vmem:[%s8238_s18 + $0x15] sm:$0x1] }
  0x49   : > { %1602 = vmatpush.bf16.msrb.mxu2 %v7733_v59  ;;  %6351 = vmatmul.msk.bf16.vlgmr.msra.gmra.mxu3 %vm1034_vm0, %v475_v0  ;;  %v486_v59 = vld [vmem:[%s8238_s18 + $0x16] sm:$0x1] }
  0x4a   : > { %1642 = vmatpush.bf16.msrb.mxu3 %v7737_v60  ;;  %v487_v60 = vld [vmem:[%s8238_s18 + $0x17] sm:$0x1] }
  0x4b   : > { %1523 = vmatpush.bf16.msrb.mxu0 %v7724_v1  ;;  %v7776_v62 = vld [vmem:[%s8243_s22 + $0x330] sm:$0xff]  ;;  %v7771_v1 = vld [vmem:[%s8243_s22 + $0x308] sm:$0xff] }
  0x4c   : > { %1563 = vmatpush.bf16.msrb.mxu1 %v7728_v2  ;;  %v7780_v63 = vld [vmem:[%s8243_s22 + $0x350] sm:$0xff]  ;;  %v7775_v2 = vld [vmem:[%s8243_s22 + $0x328] sm:$0xff] }
  0x4d   : > { %1603 = vmatpush.bf16.msrb.mxu2 %v7732_v3  ;;  %v7784_v0 = vld [vmem:[%s8243_s22 + $0x370] sm:$0xff]  ;;  %v7779_v3 = vld [vmem:[%s8243_s22 + $0x348] sm:$0xff] }
  0x4e   : > { %1643 = vmatpush.bf16.msrb.mxu3 %v7736_v4  ;;  %v7783_v4 = vld [vmem:[%s8243_s22 + $0x368] sm:$0xff] }
  0x4f   : > { %1524 = vmatpush.bf16.msrb.mxu0 %v7723_v5  ;;  %v7770_v5 = vld [vmem:[%s8243_s22 + $0x300] sm:$0xff] }
  0x50   : > { %1564 = vmatpush.bf16.msrb.mxu1 %v7727_v6  ;;  %v7774_v6 = vld [vmem:[%s8243_s22 + $0x320] sm:$0xff] }
  0x51   : > { %1604 = vmatpush.bf16.msrb.mxu2 %v7731_v7  ;;  %v7778_v7 = vld [vmem:[%s8243_s22 + $0x340] sm:$0xff] }
  0x52   : > { %1644 = vmatpush.bf16.msrb.mxu3 %v7735_v8  ;;  %v7782_v8 = vld [vmem:[%s8243_s22 + $0x360] sm:$0xff] }
  0x53   : > { %1525 = vmatpush.bf16.msrb.mxu0 %v7722_v9  ;;  %v7789_v9 = vld [vmem:[%s8243_s22 + $0x398] sm:$0xff] }
  0x54   : > { %1565 = vmatpush.bf16.msrb.mxu1 %v7726_v10  ;;  %v7793_v10 = vld [vmem:[%s8243_s22 + $0x3b8] sm:$0xff] }
  0x55   : > { %1605 = vmatpush.bf16.msrb.mxu2 %v7730_v11  ;;  %v7797_v11 = vld [vmem:[%s8243_s22 + $0x3d8] sm:$0xff] }
  0x56   : > { %1645 = vmatpush.bf16.msrb.mxu3 %v7734_v12  ;;  %6368 = vmatmul.msk.bf16.vlgmr.msrb.gmra.mxu0 %vm1034_vm0, %v476_v17  ;;  %v7801_v12 = vld [vmem:[%s8243_s22 + $0x3f8] sm:$0xff]  ;;  %v7788_v17 = vld [vmem:[%s8243_s22 + $0x390] sm:$0xff] }
  0x57   : > { %1682 = vmatpush.bf16.msra.mxu0 %v7741_v13  ;;  %6385 = vmatmul.msk.bf16.vlgmr.msrb.gmra.mxu1 %vm1034_vm0, %v477_v18  ;;  %v488_v13 = vld [vmem:[%s8238_s18 + $0x18] sm:$0x1]  ;;  %v7792_v18 = vld [vmem:[%s8243_s22 + $0x3b0] sm:$0xff] }
  0x58   : > { %1722 = vmatpush.bf16.msra.mxu1 %v7745_v14  ;;  %6402 = vmatmul.msk.bf16.vlgmr.msrb.gmra.mxu2 %vm1034_vm0, %v478_v19  ;;  %v489_v14 = vld [vmem:[%s8238_s18 + $0x19] sm:$0x1]  ;;  %v7796_v19 = vld [vmem:[%s8243_s22 + $0x3d0] sm:$0xff] }
  0x59   : > { %1762 = vmatpush.bf16.msra.mxu2 %v7749_v15  ;;  %6419 = vmatmul.msk.bf16.vlgmr.msrb.gmra.mxu3 %vm1034_vm0, %v479_v20  ;;  %v490_v15 = vld [vmem:[%s8238_s18 + $0x1a] sm:$0x1]  ;;  %v7800_v20 = vld [vmem:[%s8243_s22 + $0x3f0] sm:$0xff] }
  0x5a   : > { %1802 = vmatpush.bf16.msra.mxu3 %v7753_v16  ;;  %v491_v16 = vld [vmem:[%s8238_s18 + $0x1b] sm:$0x1] }
  0x5b   : > { %1683 = vmatpush.bf16.msra.mxu0 %v7740_v21  ;;  %v7787_v21 = vld [vmem:[%s8243_s22 + $0x388] sm:$0xff] }
  0x5c   : > { %1723 = vmatpush.bf16.msra.mxu1 %v7744_v22  ;;  %v7791_v22 = vld [vmem:[%s8243_s22 + $0x3a8] sm:$0xff] }
  0x5d   : > { %1763 = vmatpush.bf16.msra.mxu2 %v7748_v23  ;;  %v7795_v23 = vld [vmem:[%s8243_s22 + $0x3c8] sm:$0xff] }
  0x5e   : > { %1803 = vmatpush.bf16.msra.mxu3 %v7752_v24  ;;  %v7799_v24 = vld [vmem:[%s8243_s22 + $0x3e8] sm:$0xff] }
  0x5f   : > { %1684 = vmatpush.bf16.msra.mxu0 %v7739_v25  ;;  %v7786_v25 = vld [vmem:[%s8243_s22 + $0x380] sm:$0xff] }
  0x60   : > { %1724 = vmatpush.bf16.msra.mxu1 %v7743_v26  ;;  %v7790_v26 = vld [vmem:[%s8243_s22 + $0x3a0] sm:$0xff] }
  0x61   : > { %1764 = vmatpush.bf16.msra.mxu2 %v7747_v27  ;;  %v7794_v27 = vld [vmem:[%s8243_s22 + $0x3c0] sm:$0xff] }
  0x62   : > { %1804 = vmatpush.bf16.msra.mxu3 %v7751_v28  ;;  %v7798_v28 = vld [vmem:[%s8243_s22 + $0x3e0] sm:$0xff] }
  0x63   : > { %1685 = vmatpush.bf16.msra.mxu0 %v7738_v29  ;;  %v7805_v29 = vld [vmem:[%s8243_s22 + $0x418] sm:$0xff] }
  0x64   : > { %1725 = vmatpush.bf16.msra.mxu1 %v7742_v30  ;;  %v7809_v30 = vld [vmem:[%s8243_s22 + $0x438] sm:$0xff] }
  0x65   : > { %1765 = vmatpush.bf16.msra.mxu2 %v7746_v31  ;;  %v7813_v31 = vld [vmem:[%s8243_s22 + $0x458] sm:$0xff] }
  0x66   : > { %1805 = vmatpush.bf16.msra.mxu3 %v7750_v32  ;;  %6436 = vmatmul.msk.bf16.vlgmr.msra.gmra.mxu0 %vm1034_vm0, %v480_v37  ;;  %v7817_v32 = vld [vmem:[%s8243_s22 + $0x478] sm:$0xff]  ;;  %v7804_v37 = vld [vmem:[%s8243_s22 + $0x410] sm:$0xff] }
  0x67   : > { %1842 = vmatpush.bf16.msrb.mxu0 %v7757_v33  ;;  %6453 = vmatmul.msk.bf16.vlgmr.msra.gmra.mxu1 %vm1034_vm0, %v481_v38  ;;  %v492_v33 = vld [vmem:[%s8238_s18 + $0x1c] sm:$0x1]  ;;  %v7808_v38 = vld [vmem:[%s8243_s22 + $0x430] sm:$0xff] }
  0x68   : > { %1882 = vmatpush.bf16.msrb.mxu1 %v7761_v34  ;;  %6470 = vmatmul.msk.bf16.vlgmr.msra.gmra.mxu2 %vm1034_vm0, %v482_v39  ;;  %v493_v34 = vld [vmem:[%s8238_s18 + $0x1d] sm:$0x1]  ;;  %v7812_v39 = vld [vmem:[%s8243_s22 + $0x450] sm:$0xff] }
  0x69   : > { %1922 = vmatpush.bf16.msrb.mxu2 %v7765_v35  ;;  %6487 = vmatmul.msk.bf16.vlgmr.msra.gmra.mxu3 %vm1034_vm0, %v483_v40  ;;  %v494_v35 = vld [vmem:[%s8238_s18 + $0x1e] sm:$0x1]  ;;  %v7816_v40 = vld [vmem:[%s8243_s22 + $0x470] sm:$0xff] }
  0x6a   : > { %1962 = vmatpush.bf16.msrb.mxu3 %v7769_v36  ;;  %v495_v36 = vld [vmem:[%s8238_s18 + $0x1f] sm:$0x1] }
  0x6b   : > { %1843 = vmatpush.bf16.msrb.mxu0 %v7756_v41  ;;  %v7803_v41 = vld [vmem:[%s8243_s22 + $0x408] sm:$0xff] }
  0x6c   : > { %1883 = vmatpush.bf16.msrb.mxu1 %v7760_v42  ;;  %v7807_v42 = vld [vmem:[%s8243_s22 + $0x428] sm:$0xff] }
  0x6d   : > { %1923 = vmatpush.bf16.msrb.mxu2 %v7764_v43  ;;  %v7811_v43 = vld [vmem:[%s8243_s22 + $0x448] sm:$0xff] }
  0x6e   : > { %1963 = vmatpush.bf16.msrb.mxu3 %v7768_v44  ;;  %v7815_v44 = vld [vmem:[%s8243_s22 + $0x468] sm:$0xff] }
  0x6f   : > { %1844 = vmatpush.bf16.msrb.mxu0 %v7755_v45  ;;  %v7802_v45 = vld [vmem:[%s8243_s22 + $0x400] sm:$0xff] }
  0x70   : > { %1884 = vmatpush.bf16.msrb.mxu1 %v7759_v46  ;;  %v7806_v46 = vld [vmem:[%s8243_s22 + $0x420] sm:$0xff] }
  0x71   : > { %1924 = vmatpush.bf16.msrb.mxu2 %v7763_v47  ;;  %v7810_v47 = vld [vmem:[%s8243_s22 + $0x440] sm:$0xff] }
  0x72   : > { %1964 = vmatpush.bf16.msrb.mxu3 %v7767_v48  ;;  %v7814_v48 = vld [vmem:[%s8243_s22 + $0x460] sm:$0xff] }
  0x73   : > { %1845 = vmatpush.bf16.msrb.mxu0 %v7754_v49  ;;  %v7821_v49 = vld [vmem:[%s8243_s22 + $0x498] sm:$0xff] }
  0x74   : > { %1885 = vmatpush.bf16.msrb.mxu1 %v7758_v50  ;;  %v7825_v50 = vld [vmem:[%s8243_s22 + $0x4b8] sm:$0xff] }
  0x75   : > { %1925 = vmatpush.bf16.msrb.mxu2 %v7762_v51  ;;  %v7829_v51 = vld [vmem:[%s8243_s22 + $0x4d8] sm:$0xff] }
  0x76   : > { %1965 = vmatpush.bf16.msrb.mxu3 %v7766_v52  ;;  %6504 = vmatmul.msk.bf16.vlgmr.msrb.gmra.mxu0 %vm1034_vm0, %v484_v57  ;;  %v7833_v52 = vld [vmem:[%s8243_s22 + $0x4f8] sm:$0xff]  ;;  %v498_v57 = vld [vmem:[%s8238_s18 + $0x22] sm:$0x1] }
  0x77   : > { %2002 = vmatpush.bf16.msra.mxu0 %v7773_v53  ;;  %6521 = vmatmul.msk.bf16.vlgmr.msrb.gmra.mxu1 %vm1034_vm0, %v485_v58  ;;  %v499_v58 = vld [vmem:[%s8238_s18 + $0x23] sm:$0x1] }
  0x78   : > { %2042 = vmatpush.bf16.msra.mxu1 %v7777_v54  ;;  %6538 = vmatmul.msk.bf16.vlgmr.msrb.gmra.mxu2 %vm1034_vm0, %v486_v59  ;;  %v7820_v59 = vld [vmem:[%s8243_s22 + $0x490] sm:$0xff] }
  0x79   : > { %2082 = vmatpush.bf16.msra.mxu2 %v7781_v55  ;;  %6555 = vmatmul.msk.bf16.vlgmr.msrb.gmra.mxu3 %vm1034_vm0, %v487_v60  ;;  %v496_v55 = vld [vmem:[%s8238_s18 + $0x20] sm:$0x1]  ;;  %v7824_v60 = vld [vmem:[%s8243_s22 + $0x4b0] sm:$0xff] }
  0x7a   : > { %2122 = vmatpush.bf16.msra.mxu3 %v7785_v56  ;;  %v497_v56 = vld [vmem:[%s8238_s18 + $0x21] sm:$0x1] }
  0x7b   : > { %2003 = vmatpush.bf16.msra.mxu0 %v7772_v61  ;;  %v7828_v61 = vld [vmem:[%s8243_s22 + $0x4d0] sm:$0xff] }
  0x7c   : > { %2043 = vmatpush.bf16.msra.mxu1 %v7776_v62  ;;  %v7832_v62 = vld [vmem:[%s8243_s22 + $0x4f0] sm:$0xff] }
  0x7d   : > { %2083 = vmatpush.bf16.msra.mxu2 %v7780_v63  ;;  %v7819_v63 = vld [vmem:[%s8243_s22 + $0x488] sm:$0xff] }
  0x7e   : > { %2123 = vmatpush.bf16.msra.mxu3 %v7784_v0  ;;  %v7823_v0 = vld [vmem:[%s8243_s22 + $0x4a8] sm:$0xff] }
  0x7f   : > { %2004 = vmatpush.bf16.msra.mxu0 %v7771_v1  ;;  %v7827_v1 = vld [vmem:[%s8243_s22 + $0x4c8] sm:$0xff] }
  0x80   : > { %2044 = vmatpush.bf16.msra.mxu1 %v7775_v2  ;;  %v7831_v2 = vld [vmem:[%s8243_s22 + $0x4e8] sm:$0xff] }
  0x81   : > { %2084 = vmatpush.bf16.msra.mxu2 %v7779_v3 }
  0x82   : > { %2124 = vmatpush.bf16.msra.mxu3 %v7783_v4 }
  0x83   : > { %2005 = vmatpush.bf16.msra.mxu0 %v7770_v5 }
  0x84   : > { %2045 = vmatpush.bf16.msra.mxu1 %v7774_v6 }
  0x85   : > { %2085 = vmatpush.bf16.msra.mxu2 %v7778_v7  ;;  %v7818_v7 = vld [vmem:[%s8243_s22 + $0x480] sm:$0xff] }
  0x86   : > { %2125 = vmatpush.bf16.msra.mxu3 %v7782_v8  ;;  %6572 = vmatmul.msk.bf16.vlgmr.msra.gmra.mxu0 %vm1034_vm0, %v488_v13  ;;  %v7822_v8 = vld [vmem:[%s8243_s22 + $0x4a0] sm:$0xff]  ;;  %v7844_v13 = vld [vmem:[%s8258_s16 + $0x10] sm:$0xff] }
  0x87   : > { %2162 = vmatpush.bf16.msrb.mxu0 %v7789_v9  ;;  %6589 = vmatmul.msk.bf16.vlgmr.msra.gmra.mxu1 %vm1034_vm0, %v489_v14  ;;  %v7826_v9 = vld [vmem:[%s8243_s22 + $0x4c0] sm:$0xff]  ;;  %v7847_v14 = vld [vmem:[%s8258_s16 + $0x28] sm:$0xff] }
  0x88   : > { %2202 = vmatpush.bf16.msrb.mxu1 %v7793_v10  ;;  %6606 = vmatmul.msk.bf16.vlgmr.msra.gmra.mxu2 %vm1034_vm0, %v490_v15  ;;  %v7830_v10 = vld [vmem:[%s8243_s22 + $0x4e0] sm:$0xff] }
  0x89   : > { %2242 = vmatpush.bf16.msrb.mxu2 %v7797_v11  ;;  %6623 = vmatmul.msk.bf16.vlgmr.msra.gmra.mxu3 %vm1034_vm0, %v491_v16  ;;  %v7837_v11 = vld [vmem:[%s8243_s22 + $0x518] sm:$0xff] }
  0x8a   : > { %2282 = vmatpush.bf16.msrb.mxu3 %v7801_v12  ;;  %v7841_v12 = vld [vmem:[%s8243_s22 + $0x538] sm:$0xff] }
  0x8b   : > { %2163 = vmatpush.bf16.msrb.mxu0 %v7788_v17 }
  0x8c   : > { %2203 = vmatpush.bf16.msrb.mxu1 %v7792_v18 }
  0x8d   : > { %2243 = vmatpush.bf16.msrb.mxu2 %v7796_v19  ;;  %v500_v19 = vld [vmem:[%s8238_s18 + $0x24] sm:$0x1] }
  0x8e   : > { %2283 = vmatpush.bf16.msrb.mxu3 %v7800_v20  ;;  %v501_v20 = vld [vmem:[%s8238_s18 + $0x25] sm:$0x1] }
  0x8f   : > { %2164 = vmatpush.bf16.msrb.mxu0 %v7787_v21  ;;  %v502_v21 = vld [vmem:[%s8238_s18 + $0x26] sm:$0x1] }
  0x90   : > { %2204 = vmatpush.bf16.msrb.mxu1 %v7791_v22  ;;  %v503_v22 = vld [vmem:[%s8238_s18 + $0x27] sm:$0x1] }
  0x91   : > { %2244 = vmatpush.bf16.msrb.mxu2 %v7795_v23  ;;  %v7836_v23 = vld [vmem:[%s8243_s22 + $0x510] sm:$0xff] }
  0x92   : > { %2284 = vmatpush.bf16.msrb.mxu3 %v7799_v24  ;;  %v7840_v24 = vld [vmem:[%s8243_s22 + $0x530] sm:$0xff] }
  0x93   : > { %2165 = vmatpush.bf16.msrb.mxu0 %v7786_v25  ;;  %v7843_v25 = vld [vmem:[%s8258_s16 + $0x8] sm:$0xff] }
  0x94   : > { %2205 = vmatpush.bf16.msrb.mxu1 %v7790_v26  ;;  %v7846_v26 = vld [vmem:[%s8258_s16 + $0x20] sm:$0xff] }
  0x95   : > { %2245 = vmatpush.bf16.msrb.mxu2 %v7794_v27  ;;  %v8040_v27 = vld [vmem:[%s8248_s25] ss:$0 sm:$0xff] }
  0x96   : > { %2285 = vmatpush.bf16.msrb.mxu3 %v7798_v28  ;;  %6640 = vmatmul.msk.bf16.vlgmr.msrb.gmra.mxu0 %vm1034_vm0, %v492_v33  ;;  %v7835_v28 = vld [vmem:[%s8243_s22 + $0x508] sm:$0xff] }
  0x97   : > { %2322 = vmatpush.bf16.msra.mxu0 %v7805_v29  ;;  %6657 = vmatmul.msk.bf16.vlgmr.msrb.gmra.mxu1 %vm1034_vm0, %v493_v34  ;;  %v7839_v29 = vld [vmem:[%s8243_s22 + $0x528] sm:$0xff] }
  0x98   : > { %2362 = vmatpush.bf16.msra.mxu1 %v7809_v30  ;;  %6674 = vmatmul.msk.bf16.vlgmr.msrb.gmra.mxu2 %vm1034_vm0, %v494_v35  ;;  %v8041_v30 = vld [vmem:[%s8248_s25 + $0x1] ss:$0 sm:$0xff]  ;;  %v7856_v35 = vld [vmem:[%s8258_s16 + $0x70] sm:$0xff] }
  0x99   : > { %2402 = vmatpush.bf16.msra.mxu2 %v7813_v31  ;;  %6691 = vmatmul.msk.bf16.vlgmr.msrb.gmra.mxu3 %vm1034_vm0, %v495_v36  ;;  %v7842_v31 = vld [vmem:[%s8258_s16] sm:$0xff]  ;;  %v7859_v36 = vld [vmem:[%s8258_s16 + $0x88] sm:$0xff] }
  0x9a   : > { %2442 = vmatpush.bf16.msra.mxu3 %v7817_v32  ;;  %v7845_v32 = vld [vmem:[%s8258_s16 + $0x18] sm:$0xff] }
  0x9b   : > { %2323 = vmatpush.bf16.msra.mxu0 %v7804_v37 }
  0x9c   : > { %2363 = vmatpush.bf16.msra.mxu1 %v7808_v38 }
  0x9d   : > { %2403 = vmatpush.bf16.msra.mxu2 %v7812_v39  ;;  %v7834_v39 = vld [vmem:[%s8243_s22 + $0x500] sm:$0xff] }
  0x9e   : > { %2443 = vmatpush.bf16.msra.mxu3 %v7816_v40  ;;  %v7838_v40 = vld [vmem:[%s8243_s22 + $0x520] sm:$0xff] }
  0x9f   : > { %2324 = vmatpush.bf16.msra.mxu0 %v7803_v41 }
  0xa0   : > { %2364 = vmatpush.bf16.msra.mxu1 %v7807_v42 }
  0xa1   : > { %2404 = vmatpush.bf16.msra.mxu2 %v7811_v43  ;;  %v7850_v43 = vld [vmem:[%s8258_s16 + $0x40] sm:$0xff] }
  0xa2   : > { %2444 = vmatpush.bf16.msra.mxu3 %v7815_v44  ;;  %v7853_v44 = vld [vmem:[%s8258_s16 + $0x58] sm:$0xff] }
  0xa3   : > { %2325 = vmatpush.bf16.msra.mxu0 %v7802_v45  ;;  %v8478_v53 = vpop.f32.mrf.mxu0  ;;  %v7855_v45 = vld [vmem:[%s8258_s16 + $0x68] sm:$0xff] }
  0xa4   : > { %2365 = vmatpush.bf16.msra.mxu1 %v7806_v46  ;;  %v8480_v54 = vpop.f32.mrf.mxu1  ;;  %v1048_v41 = vadd.f32 %v8040_v27, %v8478_v53  ;;  %v7858_v46 = vld [vmem:[%s8258_s16 + $0x80] sm:$0xff] }
  0xa5   : > { %2405 = vmatpush.bf16.msra.mxu2 %v7810_v47  ;;  %v1088_v42 = vadd.f32 %v8041_v30, %v8480_v54 }
  0xa6   : > { %2445 = vmatpush.bf16.msra.mxu3 %v7814_v48  ;;  %6708 = vmatmul.msk.bf16.vlgmr.msra.gmra.mxu0 %vm1034_vm0, %v496_v55  ;;  %v2691_v47 = vmax.f32 %v1048_v41, 0.0  ;;  %v504_v55 = vld [vmem:[%s8238_s18 + $0x28] sm:$0x1]  ;;  %v8046_v41 = vld [vmem:[%s8248_s25 + $0x6] ss:$0 sm:$0xff] }
  0xa7   : > { %2482 = vmatpush.bf16.msrb.mxu0 %v7821_v49  ;;  %6725 = vmatmul.msk.bf16.vlgmr.msra.gmra.mxu1 %vm1034_vm0, %v497_v56  ;;  %v2692_v48 = vmax.f32 %v1088_v42, 0.0  ;;  %v7849_v49 = vld [vmem:[%s8258_s16 + $0x38] sm:$0xff]  ;;  %v505_v56 = vld [vmem:[%s8238_s18 + $0x29] sm:$0x1]  ;;  %v8047_v42 = vld [vmem:[%s8248_s25 + $0x7] ss:$0 sm:$0xff] }
  0xa8   : > { %2522 = vmatpush.bf16.msrb.mxu1 %v7825_v50  ;;  %6742 = vmatmul.msk.bf16.vlgmr.msra.gmra.mxu2 %vm1034_vm0, %v498_v57  ;;  %v7852_v50 = vld [vmem:[%s8258_s16 + $0x50] sm:$0xff]  ;;  %v7854_v57 = vld [vmem:[%s8258_s16 + $0x60] sm:$0xff] }
  0xa9   : > { %2562 = vmatpush.bf16.msrb.mxu2 %v7829_v51  ;;  %6759 = vmatmul.msk.bf16.vlgmr.msra.gmra.mxu3 %vm1034_vm0, %v499_v58  ;;  %v7857_v58 = vld [vmem:[%s8258_s16 + $0x78] sm:$0xff] }
  0xaa   : > { %2602 = vmatpush.bf16.msrb.mxu3 %v7833_v52 }
  0xab   : > { %2483 = vmatpush.bf16.msrb.mxu0 %v7820_v59  ;;  %v8498_v3 = vpop.f32.mrf.mxu2  ;;  %v1049_v5 = vpop.f32.mrf.mxu0  ;;  %v2733_v59 = vpack.c.bf16 %v2691_v47, %v2691_v47  ;;  %v7879_v47 = vld [vmem:[%s8258_s16 + $0x128] sm:$0xff] }
  0xac   : > { %2523 = vmatpush.bf16.msrb.mxu1 %v7824_v60  ;;  %v8500_v4 = vpop.f32.mrf.mxu3  ;;  %v1089_v6 = vpop.f32.mrf.mxu1  ;;  %v2734_v60 = vpack.c.bf16 %v2692_v48, %v2692_v48  ;;  %v8042_v5 = vld [vmem:[%s8248_s25 + $0x2] ss:$0 sm:$0xff] }
  0xad   : > { %2563 = vmatpush.bf16.msrb.mxu2 %v7828_v61  ;;  %v7848_v61 = vld [vmem:[%s8258_s16 + $0x30] sm:$0xff]  ;;  %v8043_v6 = vld [vmem:[%s8248_s25 + $0x3] ss:$0 sm:$0xff] }
  0xae   : > { %2603 = vmatpush.bf16.msrb.mxu3 %v7832_v62  ;;  %v7851_v62 = vld [vmem:[%s8258_s16 + $0x48] sm:$0xff]  ;;  %v7882_v48 = vld [vmem:[%s8258_s16 + $0x140] sm:$0xff] }
  0xaf   : > { %2484 = vmatpush.bf16.msrb.mxu0 %v7819_v63  ;;  %v7862_v63 = vld [vmem:[%s8258_s16 + $0xa0] sm:$0xff] }
  0xb0   : > { %2524 = vmatpush.bf16.msrb.mxu1 %v7823_v0  ;;  %v7865_v0 = vld [vmem:[%s8258_s16 + $0xb8] sm:$0xff] }
  0xb1   : > { %2564 = vmatpush.bf16.msrb.mxu2 %v7827_v1  ;;  %v7868_v1 = vld [vmem:[%s8258_s16 + $0xd0] sm:$0xff] }
  0xb2   : > { %2604 = vmatpush.bf16.msrb.mxu3 %v7831_v2  ;;  %v7871_v2 = vld [vmem:[%s8258_s16 + $0xe8] sm:$0xff] }
  0xb3   : > { %2485 = vmatpush.bf16.msrb.mxu0 %v7818_v7  ;;  %v1129_v15 = vpop.f32.mrf.mxu2  ;;  %v8510_v17 = vpop.f32.mrf.mxu0  ;;  %v8044_v7 = vld [vmem:[%s8248_s25 + $0x4] ss:$0 sm:$0xff] }
  0xb4   : > { %2525 = vmatpush.bf16.msrb.mxu1 %v7822_v8  ;;  %v1169_v16 = vpop.f32.mrf.mxu3  ;;  %v8512_v18 = vpop.f32.mrf.mxu1  ;;  %v8045_v8 = vld [vmem:[%s8248_s25 + $0x5] ss:$0 sm:$0xff]  ;;  %v7867_v15 = vld [vmem:[%s8258_s16 + $0xc8] sm:$0xff] }
  0xb5   : > { %2565 = vmatpush.bf16.msrb.mxu2 %v7826_v9  ;;  %v7870_v16 = vld [vmem:[%s8258_s16 + $0xe0] sm:$0xff] }
  0xb6   : > { %2605 = vmatpush.bf16.msrb.mxu3 %v7830_v10  ;;  %6776 = vmatmul.msk.bf16.vlgmr.msrb.gmra.mxu0 %vm1034_vm0, %v500_v19  ;;  %v1128_v19 = vadd.f32 %v8042_v5, %v8498_v3 }
  0xb7   : > { %2642 = vmatpush.bf16.msra.mxu0 %v7837_v11  ;;  %6793 = vmatmul.msk.bf16.vlgmr.msrb.gmra.mxu1 %vm1034_vm0, %v501_v20  ;;  %v7861_v11 = vld [vmem:[%s8258_s16 + $0x98] sm:$0xff]  ;;  %v1168_v20 = vadd.f32 %v8043_v6, %v8500_v4 }
  0xb8   : > { %2682 = vmatpush.bf16.msra.mxu1 %v7841_v12  ;;  %6810 = vmatmul.msk.bf16.vlgmr.msrb.gmra.mxu2 %vm1034_vm0, %v502_v21  ;;  %v7864_v12 = vld [vmem:[%s8258_s16 + $0xb0] sm:$0xff]  ;;  %v1208_v21 = vadd.f32 %v8044_v7, %v8510_v17  ;;  %v2693_v27 = vmax.f32 %v1128_v19, 0.0  ;;  %v7886_v7 = vld [vmem:[%s8258_s16 + $0x160] sm:$0xff]  ;;  %v8052_v19 = vld [vmem:[%s8248_s25 + $0xc] ss:$0 sm:$0xff] }
  0xb9   : > { %3222 = vmatpush.bf16.msra.mxu2 %v7844_v13  ;;  %6827 = vmatmul.msk.bf16.vlgmr.msrb.gmra.mxu3 %vm1034_vm0, %v503_v22  ;;  %v1248_v22 = vadd.f32 %v8045_v8, %v8512_v18  ;;  %v7889_v8 = vld [vmem:[%s8258_s16 + $0x178] sm:$0xff] }
  0xba   : > { %3256 = vmatpush.bf16.msra.mxu3 %v7847_v14 }
  0xbb   : > { %2643 = vmatpush.bf16.msra.mxu0 %v7836_v23  ;;  %v8532_v33 = vpop.f32.mrf.mxu2  ;;  %v1209_v37 = vpop.f32.mrf.mxu0  ;;  %v7860_v23 = vld [vmem:[%s8258_s16 + $0x90] sm:$0xff]  ;;  %v2696_v3 = vmax.f32 %v1248_v22, 0.0  ;;  %v8053_v22 = vld [vmem:[%s8248_s25 + $0xd] ss:$0 sm:$0xff] }
  0xbc   : > { %2683 = vmatpush.bf16.msra.mxu1 %v7840_v24  ;;  %v8534_v34 = vpop.f32.mrf.mxu3  ;;  %v1249_v38 = vpop.f32.mrf.mxu1  ;;  %v7863_v24 = vld [vmem:[%s8258_s16 + $0xa8] sm:$0xff] }
  0xbd   : > { %3223 = vmatpush.bf16.msra.mxu2 %v7843_v25  ;;  %v7866_v25 = vld [vmem:[%s8258_s16 + $0xc0] sm:$0xff]  ;;  %v2738_v38 = vpack.c.bf16 %v2696_v3, %v2696_v3 }
  0xbe   : > { %3257 = vmatpush.bf16.msra.mxu3 %v7846_v26  ;;  %v7869_v26 = vld [vmem:[%s8258_s16 + $0xd8] sm:$0xff] }
  0xbf   : > { %2644 = vmatpush.bf16.msra.mxu0 %v7835_v28  ;;  %v2694_v28 = vmax.f32 %v1168_v20, 0.0  ;;  %v7885_v20 = vld [vmem:[%s8258_s16 + $0x158] sm:$0xff] }
  0xc0   : > { %2684 = vmatpush.bf16.msra.mxu1 %v7839_v29  ;;  %v2695_v29 = vmax.f32 %v1208_v21, 0.0  ;;  %v7888_v21 = vld [vmem:[%s8258_s16 + $0x170] sm:$0xff] }
  0xc1   : > { %3224 = vmatpush.bf16.msra.mxu2 %v7842_v31  ;;  %v2735_v31 = vpack.c.bf16 %v2693_v27, %v2693_v27 }
  0xc2   : > { %3258 = vmatpush.bf16.msra.mxu3 %v7845_v32  ;;  %v2736_v32 = vpack.c.bf16 %v2694_v28, %v2694_v28  ;;  %v2737_v37 = vpack.c.bf16 %v2695_v29, %v2695_v29 }
  0xc3   : > { %2645 = vmatpush.bf16.msra.mxu0 %v7834_v39  ;;  %v1289_v51 = vpop.f32.mrf.mxu2  ;;  %v8548_v53 = vpop.f32.mrf.mxu0  ;;  %v7880_v39 = vld [vmem:[%s8258_s16 + $0x130] sm:$0xff] }
  0xc4   : > { %2685 = vmatpush.bf16.msra.mxu1 %v7838_v40  ;;  %v1329_v52 = vpop.f32.mrf.mxu3  ;;  %v8550_v54 = vpop.f32.mrf.mxu1  ;;  %v7883_v40 = vld [vmem:[%s8258_s16 + $0x148] sm:$0xff] }
  0xc5   : > { %3358 = vmatpush.bf16.msrb.mxu2 %v7856_v35  ;;  %v7874_v35 = vld [vmem:[%s8258_s16 + $0x100] sm:$0xff] }
  0xc6   : > { %3392 = vmatpush.bf16.msrb.mxu3 %v7859_v36  ;;  %6844 = vmatmul.msk.bf16.vlgmr.msra.gmra.mxu0 %vm1034_vm0, %v504_v55  ;;  %v7877_v36 = vld [vmem:[%s8258_s16 + $0x118] sm:$0xff]  ;;  %v1288_v55 = vadd.f32 %v8046_v41, %v8532_v33 }
  0xc7   : > { %3290 = vmatpush.bf16.msrb.mxu0 %v7850_v43  ;;  %6861 = vmatmul.msk.bf16.vlgmr.msra.gmra.mxu1 %vm1034_vm0, %v505_v56  ;;  %v8048_v43 = vld [vmem:[%s8248_s25 + $0x8] ss:$0 sm:$0xff]  ;;  %v1328_v56 = vadd.f32 %v8047_v42, %v8534_v34 }
  0xc8   : > { %3324 = vmatpush.bf16.msrb.mxu1 %v7853_v44  ;;  %6874 = vmatmul.msk.bf16.vlgmr.msra.gmra.mxu2 %vm3213_vm1, %v2733_v59  ;;  %v7873_v44 = vld [vmem:[%s8258_s16 + $0xf8] sm:$0xff]  ;;  %v1368_v59 = vadd.f32 %v8048_v43, %v8548_v53  ;;  %v7898_v43 = vld [vmem:[%s8258_s16 + $0x1c0] sm:$0xff] }
  0xc9   : > { %3359 = vmatpush.bf16.msrb.mxu2 %v7855_v45  ;;  %6887 = vmatmul.msk.bf16.vlgmr.msra.gmra.mxu3 %vm3213_vm1, %v2734_v60  ;;  %v7876_v45 = vld [vmem:[%s8258_s16 + $0x110] sm:$0xff] }
  0xca   : > { %3393 = vmatpush.bf16.msrb.mxu3 %v7858_v46  ;;  %v8049_v46 = vld [vmem:[%s8248_s25 + $0x9] ss:$0 sm:$0xff]  ;;  %v2699_v33 = vmax.f32 %v1368_v59, 0.0 }
  0xcb   : > { %3291 = vmatpush.bf16.msrb.mxu0 %v7849_v49  ;;  %v8570_v9 = vpop.f32.mrf.mxu2  ;;  %v1369_v13 = vpop.f32.mrf.mxu0  ;;  %v1408_v60 = vadd.f32 %v8049_v46, %v8550_v54  ;;  %v7903_v59 = vld [vmem:[%s8258_s16 + $0x1e8] sm:$0xff] }
  0xcc   : > { %3325 = vmatpush.bf16.msrb.mxu1 %v7852_v50  ;;  %v8572_v10 = vpop.f32.mrf.mxu3  ;;  %v1409_v14 = vpop.f32.mrf.mxu1  ;;  %v7892_v13 = vld [vmem:[%s8258_s16 + $0x190] sm:$0xff] }
  0xcd   : > { %3360 = vmatpush.bf16.msrb.mxu2 %v7854_v57  ;;  %v7872_v57 = vld [vmem:[%s8258_s16 + $0xf0] sm:$0xff]  ;;  %v2700_v34 = vmax.f32 %v1408_v60, 0.0  ;;  %v7895_v14 = vld [vmem:[%s8258_s16 + $0x1a8] sm:$0xff]  ;;  %v7906_v60 = vld [vmem:[%s8258_s16 + $0x200] sm:$0xff] }
  0xce   : > { %3394 = vmatpush.bf16.msrb.mxu3 %v7857_v58  ;;  %v7875_v58 = vld [vmem:[%s8258_s16 + $0x108] sm:$0xff] }
  0xcf   : > { %3292 = vmatpush.bf16.msrb.mxu0 %v7848_v61  ;;  %v7878_v61 = vld [vmem:[%s8258_s16 + $0x120] sm:$0xff] }
  0xd0   : > { %3326 = vmatpush.bf16.msrb.mxu1 %v7851_v62  ;;  %v7881_v62 = vld [vmem:[%s8258_s16 + $0x138] sm:$0xff] }
  0xd1   : > { %3494 = vmatpush.bf16.msra.mxu2 %v7868_v1 }
  0xd2   : > { %3528 = vmatpush.bf16.msra.mxu3 %v7871_v2 }
  0xd3   : > { %3426 = vmatpush.bf16.msra.mxu0 %v7862_v63  ;;  %v1449_v4 = vpop.f32.mrf.mxu2  ;;  %v8586_v18 = vpop.f32.mrf.mxu0  ;;  %v2697_v63 = vmax.f32 %v1288_v55, 0.0  ;;  %v8056_v55 = vld [vmem:[%s8248_s25 + $0x10] ss:$0 sm:$0xff] }
  0xd4   : > { %3460 = vmatpush.bf16.msra.mxu1 %v7865_v0  ;;  %v1489_v17 = vpop.f32.mrf.mxu3  ;;  %v8588_v30 = vpop.f32.mrf.mxu1  ;;  %v2698_v0 = vmax.f32 %v1328_v56, 0.0  ;;  %v7884_v4 = vld [vmem:[%s8258_s16 + $0x150] sm:$0xff]  ;;  %v7897_v56 = vld [vmem:[%s8258_s16 + $0x1b8] sm:$0xff] }
  0xd5   : > { %3495 = vmatpush.bf16.msra.mxu2 %v7867_v15  ;;  %v2739_v5 = vpack.c.bf16 %v2697_v63, %v2697_v63  ;;  %v8050_v15 = vld [vmem:[%s8248_s25 + $0xa] ss:$0 sm:$0xff] }
  0xd6   : > { %3529 = vmatpush.bf16.msra.mxu3 %v7870_v16  ;;  %6900 = vmatmul.msk.bf16.vlgmr.msrb.gmra.mxu0 %vm3213_vm1, %v2735_v31  ;;  %v2740_v6 = vpack.c.bf16 %v2698_v0, %v2698_v0  ;;  %v8051_v16 = vld [vmem:[%s8248_s25 + $0xb] ss:$0 sm:$0xff]  ;;  %v1448_v29 = vadd.f32 %v8050_v15, %v8570_v9  ;;  %v1528_v31 = vadd.f32 %v8052_v19, %v8586_v18  ;;  %v7910_v19 = vld [vmem:[%s8258_s16 + $0x220] sm:$0xff] }
  0xd7   : > { %3427 = vmatpush.bf16.msra.mxu0 %v7861_v11  ;;  %6913 = vmatmul.msk.bf16.vlgmr.msrb.gmra.mxu1 %vm3213_vm1, %v2736_v32  ;;  %v2741_v11 = vpack.c.bf16 %v2699_v33, %v2699_v33  ;;  %v1488_v3 = vadd.f32 %v8051_v16, %v8572_v10  ;;  %v7887_v17 = vld [vmem:[%s8258_s16 + $0x168] sm:$0xff]  ;;  %v1568_v32 = vadd.f32 %v8053_v22, %v8588_v30 }
  0xd8   : > { %3461 = vmatpush.bf16.msra.mxu1 %v7864_v12  ;;  %6926 = vmatmul.msk.bf16.vlgmr.msrb.gmra.mxu2 %vm3213_vm1, %v2737_v37  ;;  %v2742_v12 = vpack.c.bf16 %v2700_v34, %v2700_v34  ;;  %v2701_v37 = vmax.f32 %v1448_v29, 0.0  ;;  %v2703_v9 = vmax.f32 %v1528_v31, 0.0  ;;  %v8060_v29 = vld [vmem:[%s8248_s25 + $0x14] ss:$0 sm:$0xff]  ;;  %v7915_v31 = vld [vmem:[%s8258_s16 + $0x248] sm:$0xff] }
  0xd9   : > { %3496 = vmatpush.bf16.msra.mxu2 %v7866_v25  ;;  %6939 = vmatmul.msk.bf16.vlgmr.msrb.gmra.mxu3 %vm3213_vm1, %v2738_v38  ;;  %v2702_v38 = vmax.f32 %v1488_v3, 0.0  ;;  %v2704_v10 = vmax.f32 %v1568_v32, 0.0  ;;  %v7909_v3 = vld [vmem:[%s8258_s16 + $0x218] sm:$0xff]  ;;  %v7918_v32 = vld [vmem:[%s8258_s16 + $0x260] sm:$0xff] }
  0xda   : > { %3530 = vmatpush.bf16.msra.mxu3 %v7869_v26  ;;  %v2743_v41 = vpack.c.bf16 %v2701_v37, %v2701_v37 }
  0xdb   : > { %3428 = vmatpush.bf16.msra.mxu0 %v7860_v23  ;;  %v8606_v49 = vpop.f32.mrf.mxu2  ;;  %v1529_v51 = vpop.f32.mrf.mxu0  ;;  %v7891_v23 = vld [vmem:[%s8258_s16 + $0x188] sm:$0xff]  ;;  %v2744_v42 = vpack.c.bf16 %v2702_v38, %v2702_v38  ;;  %v2746_v46 = vpack.c.bf16 %v2704_v10, %v2704_v10 }
  0xdc   : > { %3462 = vmatpush.bf16.msra.mxu1 %v7863_v24  ;;  %v8608_v50 = vpop.f32.mrf.mxu3  ;;  %v1569_v52 = vpop.f32.mrf.mxu1  ;;  %v7894_v24 = vld [vmem:[%s8258_s16 + $0x1a0] sm:$0xff]  ;;  %v8054_v51 = vld [vmem:[%s8248_s25 + $0xe] ss:$0 sm:$0xff] }
  0xdd   : > { %3630 = vmatpush.bf16.msrb.mxu2 %v7880_v39  ;;  %v8055_v52 = vld [vmem:[%s8248_s25 + $0xf] ss:$0 sm:$0xff]  ;;  %v1608_v33 = vadd.f32 %v8054_v51, %v8606_v49 }
  0xde   : > { %3664 = vmatpush.bf16.msrb.mxu3 %v7883_v40  ;;  %v1648_v34 = vadd.f32 %v8055_v52, %v8608_v50 }
  0xdf   : > { %3562 = vmatpush.bf16.msrb.mxu0 %v7874_v35  ;;  %v7890_v35 = vld [vmem:[%s8258_s16 + $0x180] sm:$0xff] }
  0xe0   : > { %3596 = vmatpush.bf16.msrb.mxu1 %v7877_v36  ;;  %v7893_v36 = vld [vmem:[%s8258_s16 + $0x198] sm:$0xff] }
  0xe1   : > { %3631 = vmatpush.bf16.msrb.mxu2 %v7879_v47  ;;  %v7904_v47 = vld [vmem:[%s8258_s16 + $0x1f0] sm:$0xff] }
  0xe2   : > { %3665 = vmatpush.bf16.msrb.mxu3 %v7882_v48  ;;  %v7907_v48 = vld [vmem:[%s8258_s16 + $0x208] sm:$0xff] }
  0xe3   : > { %3563 = vmatpush.bf16.msrb.mxu0 %v7873_v44  ;;  %v1609_v53 = vpop.f32.mrf.mxu2  ;;  %v8618_v1 = vpop.f32.mrf.mxu0  ;;  %v7901_v44 = vld [vmem:[%s8258_s16 + $0x1d8] sm:$0xff] }
  0xe4   : > { %3597 = vmatpush.bf16.msrb.mxu1 %v7876_v45  ;;  %v1649_v54 = vpop.f32.mrf.mxu3  ;;  %v8620_v2 = vpop.f32.mrf.mxu1  ;;  %v2745_v45 = vpack.c.bf16 %v2703_v9, %v2703_v9  ;;  %v7896_v53 = vld [vmem:[%s8258_s16 + $0x1b0] sm:$0xff] }
  0xe5   : > { %3632 = vmatpush.bf16.msrb.mxu2 %v7878_v61  ;;  %v7899_v54 = vld [vmem:[%s8258_s16 + $0x1c8] sm:$0xff] }
  0xe6   : > { %3666 = vmatpush.bf16.msrb.mxu3 %v7881_v62  ;;  %6952 = vmatmul.msk.bf16.vlgmr.msra.gmra.mxu0 %vm3213_vm1, %v2739_v5  ;;  %v1688_v5 = vadd.f32 %v8056_v55, %v8618_v1  ;;  %v7922_v55 = vld [vmem:[%s8258_s16 + $0x280] sm:$0xff] }
  0xe7   : > { %3564 = vmatpush.bf16.msrb.mxu0 %v7872_v57  ;;  %6965 = vmatmul.msk.bf16.vlgmr.msra.gmra.mxu1 %vm3213_vm1, %v2740_v6  ;;  %v7900_v57 = vld [vmem:[%s8258_s16 + $0x1d0] sm:$0xff] }
  0xe8   : > { %3598 = vmatpush.bf16.msrb.mxu1 %v7875_v58  ;;  %6978 = vmatmul.msk.bf16.vlgmr.msra.gmra.mxu2 %vm3213_vm1, %v2741_v11  ;;  %v8057_v58 = vld [vmem:[%s8248_s25 + $0x11] ss:$0 sm:$0xff]  ;;  %v2705_v11 = vmax.f32 %v1608_v33, 0.0  ;;  %v2707_v49 = vmax.f32 %v1688_v5, 0.0  ;;  %v8064_v33 = vld [vmem:[%s8248_s25 + $0x18] ss:$0 sm:$0xff] }
  0xe9   : > { %6991 = vmatmul.msk.bf16.vlgmr.msra.gmra.mxu3 %vm3213_vm1, %v2742_v12  ;;  %3766 = vmatpush.bf16.msra.mxu2 %v7892_v13  ;;  %v1728_v6 = vadd.f32 %v8057_v58, %v8620_v2  ;;  %v2706_v12 = vmax.f32 %v1648_v34, 0.0  ;;  %v7921_v34 = vld [vmem:[%s8258_s16 + $0x278] sm:$0xff]  ;;  %v7927_v5 = vld [vmem:[%s8258_s16 + $0x2a8] sm:$0xff] }
  0xea   : > { %3800 = vmatpush.bf16.msra.mxu3 %v7895_v14  ;;  %v2747_v15 = vpack.c.bf16 %v2705_v11, %v2705_v11 }
  0xeb   : > { %3698 = vmatpush.bf16.msra.mxu0 %v7886_v7  ;;  %v8638_v25 = vpop.f32.mrf.mxu2  ;;  %v1689_v27 = vpop.f32.mrf.mxu0  ;;  %v7902_v7 = vld [vmem:[%s8258_s16 + $0x1e0] sm:$0xff]  ;;  %v2708_v50 = vmax.f32 %v1728_v6, 0.0  ;;  %v2748_v16 = vpack.c.bf16 %v2706_v12, %v2706_v12 }
  0xec   : > { %3732 = vmatpush.bf16.msra.mxu1 %v7889_v8  ;;  %v8640_v26 = vpop.f32.mrf.mxu3  ;;  %v1729_v28 = vpop.f32.mrf.mxu1  ;;  %v7905_v8 = vld [vmem:[%s8258_s16 + $0x1f8] sm:$0xff]  ;;  %v8058_v27 = vld [vmem:[%s8248_s25 + $0x12] ss:$0 sm:$0xff]  ;;  %v7930_v6 = vld [vmem:[%s8258_s16 + $0x2c0] sm:$0xff] }
  0xed   : > { %3767 = vmatpush.bf16.msra.mxu2 %v7891_v23  ;;  %v2750_v22 = vpack.c.bf16 %v2708_v50, %v2708_v50  ;;  %v7916_v23 = vld [vmem:[%s8258_s16 + $0x250] sm:$0xff]  ;;  %v1768_v9 = vadd.f32 %v8058_v27, %v8638_v25 }
  0xee   : > { %3801 = vmatpush.bf16.msra.mxu3 %v7894_v24  ;;  %v7919_v24 = vld [vmem:[%s8258_s16 + $0x268] sm:$0xff]  ;;  %v8059_v28 = vld [vmem:[%s8248_s25 + $0x13] ss:$0 sm:$0xff] }
  0xef   : > { %3699 = vmatpush.bf16.msra.mxu0 %v7885_v20  ;;  %v7913_v20 = vld [vmem:[%s8258_s16 + $0x238] sm:$0xff]  ;;  %v1808_v10 = vadd.f32 %v8059_v28, %v8640_v26 }
  0xf0   : > { %3733 = vmatpush.bf16.msra.mxu1 %v7888_v21  ;;  %v2749_v21 = vpack.c.bf16 %v2707_v49, %v2707_v49 }
  0xf1   : > { %3768 = vmatpush.bf16.msra.mxu2 %v7890_v35 }
  0xf2   : > { %3802 = vmatpush.bf16.msra.mxu3 %v7893_v36 }
  0xf3   : > { %3700 = vmatpush.bf16.msra.mxu0 %v7884_v4  ;;  %v1769_v18 = vpop.f32.mrf.mxu2  ;;  %v8650_v39 = vpop.f32.mrf.mxu0  ;;  %v7912_v4 = vld [vmem:[%s8258_s16 + $0x230] sm:$0xff] }
  0xf4   : > { %3734 = vmatpush.bf16.msra.mxu1 %v7887_v17  ;;  %v1809_v30 = vpop.f32.mrf.mxu3  ;;  %v8652_v40 = vpop.f32.mrf.mxu1  ;;  %v8061_v17 = vld [vmem:[%s8248_s25 + $0x15] ss:$0 sm:$0xff] }
  0xf5   : > { %v7908_v18 = vld [vmem:[%s8258_s16 + $0x210] sm:$0xff]  ;;  %v7911_v30 = vld [vmem:[%s8258_s16 + $0x228] sm:$0xff] }
  0xf6   : > { %7004 = vmatmul.msk.bf16.vlgmr.msrb.gmra.mxu0 %vm3213_vm1, %v2743_v41  ;;  %v1848_v41 = vadd.f32 %v8060_v29, %v8650_v39  ;;  %v7934_v29 = vld [vmem:[%s8258_s16 + $0x2e0] sm:$0xff] }
  0xf7   : > { %7017 = vmatmul.msk.bf16.vlgmr.msrb.gmra.mxu1 %vm3213_vm1, %v2744_v42  ;;  %3834 = vmatpush.bf16.msrb.mxu0 %v7898_v43  ;;  %v1888_v42 = vadd.f32 %v8061_v17, %v8652_v40  ;;  %v7914_v43 = vld [vmem:[%s8258_s16 + $0x240] sm:$0xff] }
  0xf8   : > { %7030 = vmatmul.msk.bf16.vlgmr.msrb.gmra.mxu2 %vm3213_vm1, %v2745_v45  ;;  %3868 = vmatpush.bf16.msrb.mxu1 %v7901_v44  ;;  %v7917_v44 = vld [vmem:[%s8258_s16 + $0x258] sm:$0xff]  ;;  %v2709_v45 = vmax.f32 %v1768_v9, 0.0  ;;  %v2711_v25 = vmax.f32 %v1848_v41, 0.0  ;;  %v7939_v41 = vld [vmem:[%s8258_s16 + $0x308] sm:$0xff] }
  0xf9   : > { %7043 = vmatmul.msk.bf16.vlgmr.msrb.gmra.mxu3 %vm3213_vm1, %v2746_v46  ;;  %3902 = vmatpush.bf16.msrb.mxu2 %v7904_v47  ;;  %v2710_v46 = vmax.f32 %v1808_v10, 0.0  ;;  %v2712_v26 = vmax.f32 %v1888_v42, 0.0  ;;  %v8068_v9 = vld [vmem:[%s8248_s25 + $0x1c] ss:$0 sm:$0xff]  ;;  %v7942_v42 = vld [vmem:[%s8258_s16 + $0x320] sm:$0xff] }
  0xfa   : > { %3936 = vmatpush.bf16.msrb.mxu3 %v7907_v48  ;;  %v2751_v51 = vpack.c.bf16 %v2709_v45, %v2709_v45  ;;  %v7933_v10 = vld [vmem:[%s8258_s16 + $0x2d8] sm:$0xff] }
  0xfb   : > { %v8670_v61 = vpop.f32.mrf.mxu2  ;;  %v1849_v63 = vpop.f32.mrf.mxu0  ;;  %3835 = vmatpush.bf16.msrb.mxu0 %v7897_v56  ;;  %v2752_v52 = vpack.c.bf16 %v2710_v46, %v2710_v46  ;;  %v7925_v56 = vld [vmem:[%s8258_s16 + $0x298] sm:$0xff]  ;;  %v2754_v58 = vpack.c.bf16 %v2712_v26, %v2712_v26 }
  0xfc   : > { %v8672_v62 = vpop.f32.mrf.mxu3  ;;  %v1889_v0 = vpop.f32.mrf.mxu1  ;;  %3869 = vmatpush.bf16.msrb.mxu1 %v7900_v57  ;;  %v2753_v57 = vpack.c.bf16 %v2711_v25, %v2711_v25  ;;  %v8062_v63 = vld [vmem:[%s8248_s25 + $0x16] ss:$0 sm:$0xff] }
  0xfd   : > { %3903 = vmatpush.bf16.msrb.mxu2 %v7903_v59  ;;  %v7928_v59 = vld [vmem:[%s8258_s16 + $0x2b0] sm:$0xff]  ;;  %v1928_v49 = vadd.f32 %v8062_v63, %v8670_v61 }
  0xfe   : > { %3937 = vmatpush.bf16.msrb.mxu3 %v7906_v60  ;;  %v7931_v60 = vld [vmem:[%s8258_s16 + $0x2c8] sm:$0xff]  ;;  %v8063_v0 = vld [vmem:[%s8248_s25 + $0x17] ss:$0 sm:$0xff] }
  0xff   : > { %3836 = vmatpush.bf16.msrb.mxu0 %v7896_v53  ;;  %v7924_v53 = vld [vmem:[%s8258_s16 + $0x290] sm:$0xff]  ;;  %v1968_v50 = vadd.f32 %v8063_v0, %v8672_v62 }
 0x100   : > { %3870 = vmatpush.bf16.msrb.mxu1 %v7899_v54  ;;  %v8065_v54 = vld [vmem:[%s8248_s25 + $0x19] ss:$0 sm:$0xff] }
 0x101   : > { %3904 = vmatpush.bf16.msrb.mxu2 %v7902_v7 }
 0x102   : > { %3938 = vmatpush.bf16.msrb.mxu3 %v7905_v8 }
 0x103   : > { %v1929_v1 = vpop.f32.mrf.mxu2  ;;  %v8682_v13 = vpop.f32.mrf.mxu0 }
 0x104   : > { %v1969_v2 = vpop.f32.mrf.mxu3  ;;  %v8684_v14 = vpop.f32.mrf.mxu1  ;;  %v7920_v1 = vld [vmem:[%s8258_s16 + $0x270] sm:$0xff] }
 0x105   : > { %v7923_v2 = vld [vmem:[%s8258_s16 + $0x288] sm:$0xff] }
 0x106   : > { %7056 = vmatmul.msk.bf16.vlgmr.msra.gmra.mxu0 %vm3213_vm1, %v2747_v15  ;;  %v2008_v15 = vadd.f32 %v8064_v33, %v8682_v13  ;;  %v7946_v33 = vld [vmem:[%s8258_s16 + $0x340] sm:$0xff] }
 0x107   : > { %7069 = vmatmul.msk.bf16.vlgmr.msra.gmra.mxu1 %vm3213_vm1, %v2748_v16  ;;  %3970 = vmatpush.bf16.msra.mxu0 %v7910_v19  ;;  %v2048_v16 = vadd.f32 %v8065_v54, %v8684_v14  ;;  %v7926_v19 = vld [vmem:[%s8258_s16 + $0x2a0] sm:$0xff] }
 0x108   : > { %7082 = vmatmul.msk.bf16.vlgmr.msra.gmra.mxu2 %vm3213_vm1, %v2749_v21  ;;  %4004 = vmatpush.bf16.msra.mxu1 %v7913_v20  ;;  %v7929_v20 = vld [vmem:[%s8258_s16 + $0x2b8] sm:$0xff]  ;;  %v2713_v21 = vmax.f32 %v1928_v49, 0.0  ;;  %v2715_v61 = vmax.f32 %v2008_v15, 0.0  ;;  %v8072_v49 = vld [vmem:[%s8248_s25 + $0x20] ss:$0 sm:$0xff]  ;;  %v7951_v15 = vld [vmem:[%s8258_s16 + $0x368] sm:$0xff] }
 0x109   : > { %7095 = vmatmul.msk.bf16.vlgmr.msra.gmra.mxu3 %vm3213_vm1, %v2750_v22  ;;  %4038 = vmatpush.bf16.msra.mxu2 %v7916_v23  ;;  %v2714_v22 = vmax.f32 %v1968_v50, 0.0  ;;  %v2716_v62 = vmax.f32 %v2048_v16, 0.0  ;;  %v7945_v50 = vld [vmem:[%s8258_s16 + $0x338] sm:$0xff]  ;;  %v7954_v16 = vld [vmem:[%s8258_s16 + $0x380] sm:$0xff] }
 0x10a   : > { %4072 = vmatpush.bf16.msra.mxu3 %v7919_v24  ;;  %v2755_v27 = vpack.c.bf16 %v2713_v21, %v2713_v21 }
 0x10b   : > { %v8702_v35 = vpop.f32.mrf.mxu2  ;;  %v2009_v37 = vpop.f32.mrf.mxu0  ;;  %3971 = vmatpush.bf16.msra.mxu0 %v7909_v3  ;;  %v2756_v28 = vpack.c.bf16 %v2714_v22, %v2714_v22  ;;  %v7937_v3 = vld [vmem:[%s8258_s16 + $0x2f8] sm:$0xff]  ;;  %v2758_v17 = vpack.c.bf16 %v2716_v62, %v2716_v62 }
 0x10c   : > { %v8704_v36 = vpop.f32.mrf.mxu3  ;;  %v2049_v38 = vpop.f32.mrf.mxu1  ;;  %4005 = vmatpush.bf16.msra.mxu1 %v7912_v4  ;;  %v2757_v4 = vpack.c.bf16 %v2715_v61, %v2715_v61  ;;  %v8066_v37 = vld [vmem:[%s8248_s25 + $0x1a] ss:$0 sm:$0xff] }
 0x10d   : > { %4039 = vmatpush.bf16.msra.mxu2 %v7915_v31  ;;  %v7940_v31 = vld [vmem:[%s8258_s16 + $0x310] sm:$0xff]  ;;  %v8067_v38 = vld [vmem:[%s8248_s25 + $0x1b] ss:$0 sm:$0xff]  ;;  %v2088_v25 = vadd.f32 %v8066_v37, %v8702_v35 }
 0x10e   : > { %4073 = vmatpush.bf16.msra.mxu3 %v7918_v32  ;;  %v7943_v32 = vld [vmem:[%s8258_s16 + $0x328] sm:$0xff]  ;;  %v2128_v26 = vadd.f32 %v8067_v38, %v8704_v36 }
 0x10f   : > { %3972 = vmatpush.bf16.msra.mxu0 %v7908_v18  ;;  %v7936_v18 = vld [vmem:[%s8258_s16 + $0x2f0] sm:$0xff] }
 0x110   : > { %4006 = vmatpush.bf16.msra.mxu1 %v7911_v30  ;;  %v8069_v30 = vld [vmem:[%s8248_s25 + $0x1d] ss:$0 sm:$0xff] }
 0x111   : > { %4040 = vmatpush.bf16.msra.mxu2 %v7914_v43 }
 0x112   : > { %4074 = vmatpush.bf16.msra.mxu3 %v7917_v44 }
 0x113   : > { %v2089_v39 = vpop.f32.mrf.mxu2  ;;  %v8714_v47 = vpop.f32.mrf.mxu0 }
 0x114   : > { %v2129_v40 = vpop.f32.mrf.mxu3  ;;  %v8716_v48 = vpop.f32.mrf.mxu1  ;;  %v7932_v39 = vld [vmem:[%s8258_s16 + $0x2d0] sm:$0xff] }
 0x115   : > { %v7935_v40 = vld [vmem:[%s8258_s16 + $0x2e8] sm:$0xff] }
 0x116   : > { %7108 = vmatmul.msk.bf16.vlgmr.msrb.gmra.mxu0 %vm3213_vm1, %v2751_v51  ;;  %v2168_v51 = vadd.f32 %v8068_v9, %v8714_v47  ;;  %v7958_v9 = vld [vmem:[%s8258_s16 + $0x3a0] sm:$0xff] }
 0x117   : > { %7121 = vmatmul.msk.bf16.vlgmr.msrb.gmra.mxu1 %vm3213_vm1, %v2752_v52  ;;  %4106 = vmatpush.bf16.msrb.mxu0 %v7922_v55  ;;  %v2208_v52 = vadd.f32 %v8069_v30, %v8716_v48  ;;  %v7938_v55 = vld [vmem:[%s8258_s16 + $0x300] sm:$0xff] }
 0x118   : > { %7134 = vmatmul.msk.bf16.vlgmr.msrb.gmra.mxu2 %vm3213_vm1, %v2753_v57  ;;  %4140 = vmatpush.bf16.msrb.mxu1 %v7925_v56  ;;  %v7941_v56 = vld [vmem:[%s8258_s16 + $0x318] sm:$0xff]  ;;  %v2717_v57 = vmax.f32 %v2088_v25, 0.0  ;;  %v2719_v35 = vmax.f32 %v2168_v51, 0.0  ;;  %v8076_v25 = vld [vmem:[%s8248_s25 + $0x24] ss:$0 sm:$0xff]  ;;  %v7963_v51 = vld [vmem:[%s8258_s16 + $0x3c8] sm:$0xff] }
 0x119   : > { %7147 = vmatmul.msk.bf16.vlgmr.msrb.gmra.mxu3 %vm3213_vm1, %v2754_v58  ;;  %4174 = vmatpush.bf16.msrb.mxu2 %v7928_v59  ;;  %v2718_v58 = vmax.f32 %v2128_v26, 0.0  ;;  %v2720_v36 = vmax.f32 %v2208_v52, 0.0  ;;  %v7957_v26 = vld [vmem:[%s8258_s16 + $0x398] sm:$0xff]  ;;  %v7966_v52 = vld [vmem:[%s8258_s16 + $0x3e0] sm:$0xff] }
 0x11a   : > { %4208 = vmatpush.bf16.msrb.mxu3 %v7931_v60  ;;  %v2759_v63 = vpack.c.bf16 %v2717_v57, %v2717_v57 }
 0x11b   : > { %v8734_v7 = vpop.f32.mrf.mxu2  ;;  %v2169_v11 = vpop.f32.mrf.mxu0  ;;  %4107 = vmatpush.bf16.msrb.mxu0 %v7921_v34  ;;  %v2760_v0 = vpack.c.bf16 %v2718_v58, %v2718_v58  ;;  %v7949_v34 = vld [vmem:[%s8258_s16 + $0x358] sm:$0xff]  ;;  %v2762_v54 = vpack.c.bf16 %v2720_v36, %v2720_v36  ;;  %v7956_v36 = vld [vmem:[%s8258_s16 + $0x390] sm:$0xff] }
 0x11c   : > { %v8736_v8 = vpop.f32.mrf.mxu3  ;;  %v2209_v12 = vpop.f32.mrf.mxu1  ;;  %4141 = vmatpush.bf16.msrb.mxu1 %v7924_v53  ;;  %v2761_v53 = vpack.c.bf16 %v2719_v35, %v2719_v35  ;;  %v8070_v11 = vld [vmem:[%s8248_s25 + $0x1e] ss:$0 sm:$0xff] }
 0x11d   : > { %4175 = vmatpush.bf16.msrb.mxu2 %v7927_v5  ;;  %v7952_v5 = vld [vmem:[%s8258_s16 + $0x370] sm:$0xff]  ;;  %v8071_v12 = vld [vmem:[%s8248_s25 + $0x1f] ss:$0 sm:$0xff]  ;;  %v2248_v61 = vadd.f32 %v8070_v11, %v8734_v7 }
 0x11e   : > { %4209 = vmatpush.bf16.msrb.mxu3 %v7930_v6  ;;  %v7955_v6 = vld [vmem:[%s8258_s16 + $0x388] sm:$0xff]  ;;  %v2288_v62 = vadd.f32 %v8071_v12, %v8736_v8  ;;  %v7420_v11 = vld [vmem:[%s8263_s20 + $0x10] sm:$0xf]  ;;  %v7970_v12 = vld [vmem:[%s8263_s20 + $0x10] sm:$0x30] }
 0x11f   : > { %4108 = vmatpush.bf16.msrb.mxu0 %v7920_v1  ;;  %v7948_v1 = vld [vmem:[%s8258_s16 + $0x350] sm:$0xff] }
 0x120   : > { %4142 = vmatpush.bf16.msrb.mxu1 %v7923_v2  ;;  %v8073_v2 = vld [vmem:[%s8248_s25 + $0x21] ss:$0 sm:$0xff] }
 0x121   : > { %4176 = vmatpush.bf16.msrb.mxu2 %v7926_v19 }
 0x122   : > { %4210 = vmatpush.bf16.msrb.mxu3 %v7929_v20 }
 0x123   : > { %v2249_v13 = vpop.f32.mrf.mxu2  ;;  %v8746_v23 = vpop.f32.mrf.mxu0 }
 0x124   : > { %v2289_v14 = vpop.f32.mrf.mxu3  ;;  %v8748_v24 = vpop.f32.mrf.mxu1  ;;  %v7944_v13 = vld [vmem:[%s8258_s16 + $0x330] sm:$0xff] }
 0x125   : > { %v7947_v14 = vld [vmem:[%s8258_s16 + $0x348] sm:$0xff] }
 0x126   : > { %7160 = vmatmul.msk.bf16.vlgmr.msra.gmra.mxu0 %vm3213_vm1, %v2755_v27  ;;  %v2328_v27 = vadd.f32 %v8072_v49, %v8746_v23  ;;  %v7425_v49 = vld [vmem:[%s8263_s20 + $0x18] sm:$0xf] }
 0x127   : > { %7173 = vmatmul.msk.bf16.vlgmr.msra.gmra.mxu1 %vm3213_vm1, %v2756_v28  ;;  %4242 = vmatpush.bf16.msra.mxu0 %v7934_v29  ;;  %v2368_v28 = vadd.f32 %v8073_v2, %v8748_v24  ;;  %v7950_v29 = vld [vmem:[%s8258_s16 + $0x360] sm:$0xff] }
 0x128   : > { %7186 = vmatmul.msk.bf16.vlgmr.msra.gmra.mxu2 %vm3213_vm1, %v2757_v4  ;;  %4276 = vmatpush.bf16.msra.mxu1 %v7937_v3  ;;  %v7953_v3 = vld [vmem:[%s8258_s16 + $0x378] sm:$0xff]  ;;  %v2721_v4 = vmax.f32 %v2248_v61, 0.0  ;;  %v2723_v7 = vmax.f32 %v2328_v27, 0.0 }
 0x129   : > { %7199 = vmatmul.msk.bf16.vlgmr.msra.gmra.mxu3 %vm3213_vm1, %v2758_v17  ;;  %4310 = vmatpush.bf16.msra.mxu2 %v7940_v31  ;;  %v2722_v17 = vmax.f32 %v2288_v62, 0.0  ;;  %v2724_v8 = vmax.f32 %v2368_v28, 0.0 }
 0x12a   : > { %4344 = vmatpush.bf16.msra.mxu3 %v7943_v32  ;;  %v2763_v37 = vpack.c.bf16 %v2721_v4, %v2721_v4 }
 0x12b   : > { %v8766_v43 = vpop.f32.mrf.mxu2  ;;  %v2329_v45 = vpop.f32.mrf.mxu0  ;;  %4243 = vmatpush.bf16.msra.mxu0 %v7933_v10  ;;  %v2764_v38 = vpack.c.bf16 %v2722_v17, %v2722_v17  ;;  %v7961_v10 = vld [vmem:[%s8258_s16 + $0x3b8] sm:$0xff]  ;;  %v2766_v30 = vpack.c.bf16 %v2724_v8, %v2724_v8 }
 0x12c   : > { %v8768_v44 = vpop.f32.mrf.mxu3  ;;  %v2369_v46 = vpop.f32.mrf.mxu1  ;;  %4277 = vmatpush.bf16.msra.mxu1 %v7936_v18  ;;  %v2765_v18 = vpack.c.bf16 %v2723_v7, %v2723_v7  ;;  %v8074_v45 = vld [vmem:[%s8248_s25 + $0x22] ss:$0 sm:$0xff] }
 0x12d   : > { %4311 = vmatpush.bf16.msra.mxu2 %v7939_v41  ;;  %v7964_v41 = vld [vmem:[%s8258_s16 + $0x3d0] sm:$0xff]  ;;  %v8075_v46 = vld [vmem:[%s8248_s25 + $0x23] ss:$0 sm:$0xff] }
 0x12e   : > { %4345 = vmatpush.bf16.msra.mxu3 %v7942_v42  ;;  %v7967_v42 = vld [vmem:[%s8258_s16 + $0x3e8] sm:$0xff] }
 0x12f   : > { %4244 = vmatpush.bf16.msra.mxu0 %v7932_v39  ;;  %v7960_v39 = vld [vmem:[%s8258_s16 + $0x3b0] sm:$0xff] }
 0x130   : > { %4278 = vmatpush.bf16.msra.mxu1 %v7935_v40  ;;  %v8077_v40 = vld [vmem:[%s8248_s25 + $0x25] ss:$0 sm:$0xff] }
 0x131   : > { %4312 = vmatpush.bf16.msra.mxu2 %v7938_v55  ;;  %v2408_v55 = vadd.f32 %v8074_v45, %v8766_v43  ;;  %v7962_v43 = vld [vmem:[%s8258_s16 + $0x3c0] sm:$0xff] }
 0x132   : > { %4346 = vmatpush.bf16.msra.mxu3 %v7941_v56 }
 0x133   : > { %v2409_v47 = vpop.f32.mrf.mxu2  ;;  %v8778_v59 = vpop.f32.mrf.mxu0 }
 0x134   : > { %v2449_v48 = vpop.f32.mrf.mxu3  ;;  %v8780_v60 = vpop.f32.mrf.mxu1  ;;  %v7959_v47 = vld [vmem:[%s8258_s16 + $0x3a8] sm:$0xff] }
 0x135   : > { %v2448_v48 = vadd.f32 %v8075_v46, %v8768_v44  ;;  %v8167_v44 = vmov 65535   ;;  %v7430_v46 = vld [vmem:[%s8263_s20 + $0x20] sm:$0xf] }
 0x136   : > { %7212 = vmatmul.msk.bf16.vlgmr.msrb.gmra.mxu0 %vm3213_vm1, %v2759_v63  ;;  %v2488_v63 = vadd.f32 %v8076_v25, %v8778_v59  ;;  %v4803_v59 = vsel %vm4801_vm2, 4294967295, %v8167_v44 }
 0x137   : > { %7225 = vmatmul.msk.bf16.vlgmr.msrb.gmra.mxu1 %vm3213_vm1, %v2760_v0  ;;  %4378 = vmatpush.bf16.msrb.mxu0 %v7946_v33  ;;  %v7965_v0 = vld [vmem:[%s8258_s16 + $0x3d8] sm:$0xff]  ;;  %v7410_v33 = vld [vmem:[%s8263_s20] sm:$0xf] }
 0x138   : > { %7238 = vmatmul.msk.bf16.vlgmr.msrb.gmra.mxu2 %vm3213_vm1, %v2761_v53  ;;  %4412 = vmatpush.bf16.msrb.mxu1 %v7949_v34  ;;  %v2528_v34 = vadd.f32 %v8077_v40, %v8780_v60  ;;  %v7968_v53 = vld [vmem:[%s8263_s20] sm:$0x30]  ;;  %v7435_v40 = vld [vmem:[%s8263_s20 + $0x28] sm:$0xf] }
 0x139   : > { %7251 = vmatmul.msk.bf16.vlgmr.msrb.gmra.mxu3 %vm3213_vm1, %v2762_v54  ;;  %4446 = vmatpush.bf16.msrb.mxu2 %v7952_v5  ;;  %v7415_v54 = vld [vmem:[%s8263_s20 + $0x8] sm:$0xf]  ;;  %v7969_v5 = vld [vmem:[%s8263_s20 + $0x8] sm:$0x30]  ;;  %v7411_v2 = vor.u32 %v7968_v53, %v7410_v33 }
 0x13a   : > { %4480 = vmatpush.bf16.msrb.mxu3 %v7955_v6  ;;  %v2725_v6 = vmax.f32 %v2408_v55, 0.0  ;;  %v7416_v60 = vor.u32 %v7969_v5, %v7415_v54  ;;  %v7974_v55 = vld [vmem:[%s8263_s20 + $0x30] sm:$0x30] }
 0x13b   : > { %v8798_v19 = vpop.f32.mrf.mxu2  ;;  %v2489_v21 = vpop.f32.mrf.mxu0  ;;  %4379 = vmatpush.bf16.msrb.mxu0 %v7945_v50  ;;  %v2726_v50 = vmax.f32 %v2448_v48, 0.0 }
 0x13c   : > { %v8800_v20 = vpop.f32.mrf.mxu3  ;;  %v2529_v22 = vpop.f32.mrf.mxu1  ;;  %4413 = vmatpush.bf16.msrb.mxu1 %v7948_v1  ;;  %v2727_v1 = vmax.f32 %v2488_v63, 0.0  ;;  %v8852_v21 = vsel %vm4802_vm3, %v4803_v59, 0  ;;  %v2767_v28 = vpack.c.bf16 %v2725_v6, %v2725_v6  ;;  %v7975_v63 = vld [vmem:[%s8263_s20 + $0x38] sm:$0x30] }
 0x13d   : > { %4447 = vmatpush.bf16.msrb.mxu2 %v7951_v15  ;;  %v7971_v15 = vld [vmem:[%s8263_s20 + $0x18] sm:$0x30]  ;;  %v7421_v22 = vor.u32 %v7970_v12, %v7420_v11  ;;  %v4830_v4 = vand.u32 %v7416_v60, %v8852_v21 }
 0x13e   : > { %4481 = vmatpush.bf16.msrb.mxu3 %v7954_v16  ;;  %v2728_v16 = vmax.f32 %v2528_v34, 0.0  ;;  %v7426_v61 = vor.u32 %v7971_v15, %v7425_v49  ;;  %v2769_v17 = vpack.c.bf16 %v2727_v1, %v2727_v1  ;;  %v8082_v49 = vld [vmem:[%s8253_s29] ss:$0 sm:$0xff]  ;;  %v8084_v1 = vld [vmem:[%s8253_s29 + $0x2] ss:$0 sm:$0xff] }
 0x13f   : > { %4380 = vmatpush.bf16.msrb.mxu0 %v7944_v13  ;;  %v4854_v8 = vand.u32 %v7421_v22, %v8852_v21 }
 0x140   : > { %4414 = vmatpush.bf16.msrb.mxu1 %v7947_v14  ;;  %v2770_v7 = vpack.c.bf16 %v2728_v16, %v2728_v16 }
 0x141   : > { %4448 = vmatpush.bf16.msrb.mxu2 %v7950_v29  ;;  %v2768_v29 = vpack.c.bf16 %v2726_v50, %v2726_v50  ;;  %v8083_v50 = vld [vmem:[%s8253_s29 + $0x1] ss:$0 sm:$0xff] }
 0x142   : > { %4482 = vmatpush.bf16.msrb.mxu3 %v7953_v3  ;;  %v4806_v3 = vand.u32 %v7411_v2, %v8852_v21  ;;  %v8085_v2 = vld [vmem:[%s8253_s29 + $0x3] ss:$0 sm:$0xff] }
 0x143   : > { %v2569_v23 = vpop.f32.mrf.mxu2  ;;  %v8810_v31 = vpop.f32.mrf.mxu0 }
 0x144   : > { %v2609_v24 = vpop.f32.mrf.mxu3  ;;  %v8812_v32 = vpop.f32.mrf.mxu1  ;;  %v4878_v23 = vand.u32 %v7426_v61, %v8852_v21 }
 0x145   : > { %v8078_v24 = vld [vmem:[%s8248_s25 + $0x26] ss:$0 sm:$0xff] }
 0x146   : > { %7264 = vmatmul.msk.bf16.vlgmr.msra.gmra.mxu0 %vm3213_vm1, %v2763_v37  ;;  %v8079_v37 = vld [vmem:[%s8248_s25 + $0x27] ss:$0 sm:$0xff] }
 0x147   : > { %7277 = vmatmul.msk.bf16.vlgmr.msra.gmra.mxu1 %vm3213_vm1, %v2764_v38  ;;  %4514 = vmatpush.bf16.msra.mxu0 %v7958_v9  ;;  %v8080_v38 = vld [vmem:[%s8248_s25 + $0x28] ss:$0 sm:$0xff]  ;;  %v8081_v9 = vld [vmem:[%s8248_s25 + $0x29] ss:$0 sm:$0xff]  ;;  %v2608_v45 = vadd.f32 %v8079_v37, %v8800_v20 }
 0x148   : > { %7290 = vmatmul.msk.bf16.vlgmr.msra.gmra.mxu2 %vm3213_vm1, %v2765_v18  ;;  %4548 = vmatpush.bf16.msra.mxu1 %v7961_v10  ;;  %v2648_v25 = vadd.f32 %v8080_v38, %v8810_v31 }
 0x149   : > { %7303 = vmatmul.msk.bf16.vlgmr.msra.gmra.mxu3 %vm3213_vm1, %v2766_v30  ;;  %4582 = vmatpush.bf16.msra.mxu2 %v7964_v41 }
 0x14a   : > { %4616 = vmatpush.bf16.msra.mxu3 %v7967_v42  ;;  %v2568_v42 = vadd.f32 %v8078_v24, %v8798_v19 }
 0x14b   : > { %v8831_v56 = vpop.f32.mrf.mxu2  ;;  %v2649_v58 = vpop.f32.mrf.mxu0  ;;  %4515 = vmatpush.bf16.msra.mxu0 %v7957_v26  ;;  %v2688_v26 = vadd.f32 %v8081_v9, %v8812_v32 }
 0x14c   : > { %v8833_v57 = vpop.f32.mrf.mxu3  ;;  %v2689_v35 = vpop.f32.mrf.mxu1  ;;  %4549 = vmatpush.bf16.msra.mxu1 %v7960_v39  ;;  %v7972_v39 = vld [vmem:[%s8263_s20 + $0x20] sm:$0x30]  ;;  %v7445_v58 = vld [vmem:[%s8263_s20 + $0x38] sm:$0xf]  ;;  %v3227_v61 = vadd.f32 %v8082_v49, %v8831_v56 }
 0x14d   : > { %4583 = vmatpush.bf16.msra.mxu2 %v7963_v51  ;;  %v7973_v51 = vld [vmem:[%s8263_s20 + $0x28] sm:$0x30]  ;;  %v2729_v35 = vmax.f32 %v2568_v42, 0.0  ;;  %v2732_v19 = vmax.f32 %v2688_v26, 0.0  ;;  %v7446_v20 = vor.u32 %v7975_v63, %v7445_v58 }
 0x14e   : > { %4617 = vmatpush.bf16.msra.mxu3 %v7966_v52  ;;  %v7440_v52 = vld [vmem:[%s8263_s20 + $0x30] sm:$0xf]  ;;  %v7436_v48 = vor.u32 %v7973_v51, %v7435_v40  ;;  %v4624_v24 = vmax.f32 %v3227_v61, 0.0 }
 0x14f   : > { %4516 = vmatpush.bf16.msra.mxu0 %v7956_v36  ;;  %v2730_v36 = vmax.f32 %v2608_v45, 0.0  ;;  %v2771_v53 = vpack.c.bf16 %v2729_v35, %v2729_v35  ;;  %v2774_v59 = vpack.c.bf16 %v2732_v19, %v2732_v19  ;;  %v4974_v12 = vand.u32 %v7446_v20, %v8852_v21  ;;  %v8086_v35 = vld [vmem:[%s8253_s29 + $0x4] ss:$0 sm:$0xff] }
 0x150   : > { %4550 = vmatpush.bf16.msra.mxu1 %v7959_v47  ;;  %v7431_v47 = vor.u32 %v7972_v39, %v7430_v46  ;;  %v4926_v6 = vand.u32 %v7436_v48, %v8852_v21  ;;  %v8089_v48 = vld [vmem:[%s8253_s29 + $0x7] ss:$0 sm:$0xff] }
 0x151   : > { %4584 = vmatpush.bf16.msra.mxu2 %v7962_v43  ;;  %v2731_v43 = vmax.f32 %v2648_v25, 0.0  ;;  %v2772_v54 = vpack.c.bf16 %v2730_v36, %v2730_v36  ;;  %v4666_v25 = vpack.c.bf16 %v4624_v24, %v4624_v24  ;;  %v8087_v36 = vld [vmem:[%s8253_s29 + $0x5] ss:$0 sm:$0xff]  ;;  %v8090_v24 = vld [vmem:[%s8253_s29 + $0x8] ss:$0 sm:$0xff] }
 0x152   : > { %4618 = vmatpush.bf16.msra.mxu3 %v7965_v0  ;;  %v7441_v0 = vor.u32 %v7974_v55, %v7440_v52  ;;  %v4902_v5 = vand.u32 %v7431_v47, %v8852_v21  ;;  %v8088_v47 = vld [vmem:[%s8253_s29 + $0x6] ss:$0 sm:$0xff] }
 0x153   : > { %v3228_v62 = vpop.f32.mrf.mxu2  ;;  %v8854_v14 = vpop.f32.mrf.mxu0  ;;  %v2773_v44 = vpack.c.bf16 %v2731_v43, %v2731_v43 }
 0x154   : > { %v3262_v13 = vpop.f32.mrf.mxu3  ;;  %v8856_v27 = vpop.f32.mrf.mxu1  ;;  %v4950_v11 = vand.u32 %v7441_v0, %v8852_v21  ;;  %v3261_v62 = vadd.f32 %v8083_v50, %v8833_v57 }
 0x155   : > { %v7450_v13 = vld [vmem:[%s8263_s20 + $0x40] sm:$0xf] }
 0x156   : > { %7316 = vmatmul.msk.bf16.vlgmr.msrb.gmra.mxu0 %vm3213_vm1, %v2767_v28  ;;  %v3295_v28 = vadd.f32 %v8084_v1, %v8854_v14  ;;  %v4625_v37 = vmax.f32 %v3261_v62, 0.0 }
 0x157   : > { %7329 = vmatmul.msk.bf16.vlgmr.msrb.gmra.mxu1 %vm3213_vm1, %v2768_v29  ;;  %4815 = vmatpush.bf16.msrb.mxu0 %v4806_v3  ;;  %v3329_v29 = vadd.f32 %v8085_v2, %v8856_v27  ;;  %v7976_v3 = vld [vmem:[%s8263_s20 + $0x40] sm:$0x30] }
 0x158   : > { %7342 = vmatmul.msk.bf16.vlgmr.msrb.gmra.mxu2 %vm3213_vm1, %v2769_v17  ;;  %4839 = vmatpush.bf16.msrb.mxu1 %v4830_v4  ;;  %v7455_v4 = vld [vmem:[%s8263_s20 + $0x48] sm:$0xf]  ;;  %v7977_v17 = vld [vmem:[%s8263_s20 + $0x48] sm:$0x30]  ;;  %v7451_v38 = vor.u32 %v7976_v3, %v7450_v13  ;;  %v4667_v26 = vpack.c.bf16 %v4625_v37, %v4625_v37 }
 0x159   : > { %7355 = vmatmul.msk.bf16.vlgmr.msrb.gmra.mxu3 %vm3213_vm1, %v2770_v7  ;;  %4863 = vmatpush.bf16.msrb.mxu2 %v4854_v8  ;;  %v7460_v7 = vld [vmem:[%s8263_s20 + $0x50] sm:$0xf]  ;;  %v7978_v8 = vld [vmem:[%s8263_s20 + $0x50] sm:$0x30]  ;;  %v7456_v9 = vor.u32 %v7977_v17, %v7455_v4  ;;  %v4627_v56 = vmax.f32 %v3329_v29, 0.0 }
 0x15a   : > { %4887 = vmatpush.bf16.msrb.mxu3 %v4878_v23  ;;  %v7465_v23 = vld [vmem:[%s8263_s20 + $0x58] sm:$0xf]  ;;  %v7461_v42 = vor.u32 %v7978_v8, %v7460_v7  ;;  %v4998_v39 = vand.u32 %v7451_v38, %v8852_v21  ;;  %v8091_v37 = vld [vmem:[%s8253_s29 + $0x9] ss:$0 sm:$0xff]  ;;  %v8092_v38 = vld [vmem:[%s8253_s29 + $0xa] ss:$0 sm:$0xff] }
 0x15b   : > { %v8870_v10 = vpop.f32.mrf.mxu2  ;;  %v3296_v30 = vpop.f32.mrf.mxu0  ;;  %v5022_v40 = vand.u32 %v7456_v9, %v8852_v21  ;;  %v4669_v52 = vpack.c.bf16 %v4627_v56, %v4627_v56  ;;  %v8093_v9 = vld [vmem:[%s8253_s29 + $0xb] ss:$0 sm:$0xff] }
 0x15c   : > { %v8872_v18 = vpop.f32.mrf.mxu3  ;;  %v3330_v41 = vpop.f32.mrf.mxu1  ;;  %v7979_v30 = vld [vmem:[%s8263_s20 + $0x58] sm:$0x30]  ;;  %v5046_v55 = vand.u32 %v7461_v42, %v8852_v21  ;;  %v3363_v20 = vadd.f32 %v8086_v35, %v8870_v10 }
 0x15d   : > { %v4626_v41 = vmax.f32 %v3295_v28, 0.0  ;;  %v7466_v57 = vor.u32 %v7979_v30, %v7465_v23 }
 0x15e   : > { %v4628_v49 = vmax.f32 %v3363_v20, 0.0 }
 0x15f   : > { %v4668_v51 = vpack.c.bf16 %v4626_v41, %v4626_v41  ;;  %v5070_v58 = vand.u32 %v7466_v57, %v8852_v21 }
 0x160   : > { %v4670_v28 = vpack.c.bf16 %v4628_v49, %v4628_v49  ;;  %v8094_v49 = vld [vmem:[%s8253_s29 + $0xc] ss:$0 sm:$0xff] }
 0x163   : > { %v3364_v33 = vpop.f32.mrf.mxu2  ;;  %v8886_v32 = vpop.f32.mrf.mxu0 }
 0x164   : > { %v3398_v31 = vpop.f32.mrf.mxu3  ;;  %v8888_v34 = vpop.f32.mrf.mxu1  ;;  %v3397_v33 = vadd.f32 %v8087_v36, %v8872_v18 }
 0x165   : > { %v7470_v31 = vld [vmem:[%s8263_s20 + $0x60] sm:$0xf] }
 0x166   : > { %7368 = vmatmul.msk.bf16.vlgmr.msra.gmra.mxu0 %vm3213_vm1, %v2771_v53  ;;  %v3431_v53 = vadd.f32 %v8088_v47, %v8886_v32  ;;  %v4629_v50 = vmax.f32 %v3397_v33, 0.0 }
 0x167   : > { %7381 = vmatmul.msk.bf16.vlgmr.msra.gmra.mxu1 %vm3213_vm1, %v2772_v54  ;;  %4911 = vmatpush.bf16.msra.mxu0 %v4902_v5  ;;  %v3465_v54 = vadd.f32 %v8089_v48, %v8888_v34  ;;  %v7980_v5 = vld [vmem:[%s8263_s20 + $0x60] sm:$0x30] }
 0x168   : > { %7394 = vmatmul.msk.bf16.vlgmr.msra.gmra.mxu2 %vm3213_vm1, %v2773_v44  ;;  %4935 = vmatpush.bf16.msra.mxu1 %v4926_v6  ;;  %v7475_v6 = vld [vmem:[%s8263_s20 + $0x68] sm:$0xf]  ;;  %v7981_v44 = vld [vmem:[%s8263_s20 + $0x68] sm:$0x30]  ;;  %v7471_v1 = vor.u32 %v7980_v5, %v7470_v31  ;;  %v4671_v29 = vpack.c.bf16 %v4629_v50, %v4629_v50 }
 0x169   : > { %7407 = vmatmul.msk.bf16.vlgmr.msra.gmra.mxu3 %vm3213_vm1, %v2774_v59  ;;  %4959 = vmatpush.bf16.msra.mxu2 %v4950_v11  ;;  %v7480_v59 = vld [vmem:[%s8263_s20 + $0x70] sm:$0xf]  ;;  %v7982_v11 = vld [vmem:[%s8263_s20 + $0x70] sm:$0x30]  ;;  %v7476_v2 = vor.u32 %v7981_v44, %v7475_v6  ;;  %v4631_v10 = vmax.f32 %v3465_v54, 0.0 }
 0x16a   : > { %4983 = vmatpush.bf16.msra.mxu3 %v4974_v12  ;;  %v7485_v12 = vld [vmem:[%s8263_s20 + $0x78] sm:$0xf]  ;;  %v7481_v61 = vor.u32 %v7982_v11, %v7480_v59  ;;  %v5094_v3 = vand.u32 %v7471_v1, %v8852_v21  ;;  %v8095_v50 = vld [vmem:[%s8253_s29 + $0xd] ss:$0 sm:$0xff]  ;;  %v8096_v1 = vld [vmem:[%s8253_s29 + $0xe] ss:$0 sm:$0xff] }
 0x16b   : > { %v8902_v60 = vpop.f32.mrf.mxu2  ;;  %v3432_v16 = vpop.f32.mrf.mxu0  ;;  %v5118_v4 = vand.u32 %v7476_v2, %v8852_v21  ;;  %v4673_v7 = vpack.c.bf16 %v4631_v10, %v4631_v10  ;;  %v8097_v2 = vld [vmem:[%s8253_s29 + $0xf] ss:$0 sm:$0xff] }
 0x16c   : > { %v8904_v15 = vpop.f32.mrf.mxu3  ;;  %v3466_v22 = vpop.f32.mrf.mxu1  ;;  %v7983_v16 = vld [vmem:[%s8263_s20 + $0x78] sm:$0x30]  ;;  %v5142_v8 = vand.u32 %v7481_v61, %v8852_v21  ;;  %v3499_v57 = vadd.f32 %v8090_v24, %v8902_v60 }
 0x16d   : > { %v4630_v22 = vmax.f32 %v3431_v53, 0.0  ;;  %v7486_v18 = vor.u32 %v7983_v16, %v7485_v12 }
 0x16e   : > { %v4632_v35 = vmax.f32 %v3499_v57, 0.0 }
 0x16f   : > { %v4672_v17 = vpack.c.bf16 %v4630_v22, %v4630_v22  ;;  %v5166_v23 = vand.u32 %v7486_v18, %v8852_v21 }
 0x170   : > { %v4674_v53 = vpack.c.bf16 %v4632_v35, %v4632_v35  ;;  %v8098_v35 = vld [vmem:[%s8253_s29 + $0x10] ss:$0 sm:$0xff] }
 0x173   : > { %v3500_v45 = vpop.f32.mrf.mxu2  ;;  %v8918_v14 = vpop.f32.mrf.mxu0 }
 0x174   : > { %v3534_v46 = vpop.f32.mrf.mxu3  ;;  %v8920_v27 = vpop.f32.mrf.mxu1  ;;  %v3533_v45 = vadd.f32 %v8091_v37, %v8904_v15 }
 0x175   : > { %v7490_v46 = vld [vmem:[%s8263_s20 + $0x80] sm:$0xf] }
 0x176   : > { %7412 = vmatmul.msk.bf16.vlgmr.msrb.gmra.mxu0 %vm4797_vm4, %v4666_v25  ;;  %v3567_v25 = vadd.f32 %v8092_v38, %v8918_v14  ;;  %v4633_v36 = vmax.f32 %v3533_v45, 0.0 }
 0x177   : > { %7417 = vmatmul.msk.bf16.vlgmr.msrb.gmra.mxu1 %vm4797_vm4, %v4667_v26  ;;  %5007 = vmatpush.bf16.msrb.mxu0 %v4998_v39  ;;  %v3601_v26 = vadd.f32 %v8093_v9, %v8920_v27  ;;  %v7984_v39 = vld [vmem:[%s8263_s20 + $0x80] sm:$0x30] }
 0x178   : > { %7422 = vmatmul.msk.bf16.vlgmr.msrb.gmra.mxu2 %vm4797_vm4, %v4668_v51  ;;  %5031 = vmatpush.bf16.msrb.mxu1 %v5022_v40  ;;  %v7495_v40 = vld [vmem:[%s8263_s20 + $0x88] sm:$0xf]  ;;  %v7985_v51 = vld [vmem:[%s8263_s20 + $0x88] sm:$0x30]  ;;  %v7491_v47 = vor.u32 %v7984_v39, %v7490_v46  ;;  %v4675_v54 = vpack.c.bf16 %v4633_v36, %v4633_v36  ;;  %v8099_v36 = vld [vmem:[%s8253_s29 + $0x11] ss:$0 sm:$0xff] }
 0x179   : > { %7427 = vmatmul.msk.bf16.vlgmr.msrb.gmra.mxu3 %vm4797_vm4, %v4669_v52  ;;  %5055 = vmatpush.bf16.msrb.mxu2 %v5046_v55  ;;  %v7500_v52 = vld [vmem:[%s8263_s20 + $0x90] sm:$0xf]  ;;  %v7986_v55 = vld [vmem:[%s8263_s20 + $0x90] sm:$0x30]  ;;  %v7496_v48 = vor.u32 %v7985_v51, %v7495_v40  ;;  %v4635_v60 = vmax.f32 %v3601_v26, 0.0 }
 0x17a   : > { %5079 = vmatpush.bf16.msrb.mxu3 %v5070_v58  ;;  %v7505_v58 = vld [vmem:[%s8263_s20 + $0x98] sm:$0xf]  ;;  %v7501_v20 = vor.u32 %v7986_v55, %v7500_v52  ;;  %v5190_v5 = vand.u32 %v7491_v47, %v8852_v21  ;;  %v8100_v47 = vld [vmem:[%s8253_s29 + $0x12] ss:$0 sm:$0xff] }
 0x17b   : > { %v8934_v63 = vpop.f32.mrf.mxu2  ;;  %v3568_v19 = vpop.f32.mrf.mxu0  ;;  %v5214_v6 = vand.u32 %v7496_v48, %v8852_v21  ;;  %v4677_v59 = vpack.c.bf16 %v4635_v60, %v4635_v60  ;;  %v8101_v48 = vld [vmem:[%s8253_s29 + $0x13] ss:$0 sm:$0xff] }
 0x17c   : > { %v8936_v43 = vpop.f32.mrf.mxu3  ;;  %v3602_v0 = vpop.f32.mrf.mxu1  ;;  %v7987_v19 = vld [vmem:[%s8263_s20 + $0x98] sm:$0x30]  ;;  %v5238_v11 = vand.u32 %v7501_v20, %v8852_v21  ;;  %v3635_v18 = vadd.f32 %v8094_v49, %v8934_v63 }
 0x17d   : > { %v4634_v0 = vmax.f32 %v3567_v25, 0.0  ;;  %v7506_v15 = vor.u32 %v7987_v19, %v7505_v58 }
 0x17e   : > { %v4636_v24 = vmax.f32 %v3635_v18, 0.0 }
 0x17f   : > { %v4676_v44 = vpack.c.bf16 %v4634_v0, %v4634_v0  ;;  %v5262_v12 = vand.u32 %v7506_v15, %v8852_v21 }
 0x180   : > { %v4678_v25 = vpack.c.bf16 %v4636_v24, %v4636_v24  ;;  %v8102_v24 = vld [vmem:[%s8253_s29 + $0x14] ss:$0 sm:$0xff] }
 0x183   : > { %v3636_v62 = vpop.f32.mrf.mxu2  ;;  %v8950_v34 = vpop.f32.mrf.mxu0 }
 0x184   : > { %v3670_v32 = vpop.f32.mrf.mxu3  ;;  %v8952_v13 = vpop.f32.mrf.mxu1  ;;  %v3669_v62 = vadd.f32 %v8095_v50, %v8936_v43 }
 0x185   : > { %v7510_v32 = vld [vmem:[%s8263_s20 + $0xa0] sm:$0xf] }
 0x186   : > { %7432 = vmatmul.msk.bf16.vlgmr.msra.gmra.mxu0 %vm4797_vm4, %v4670_v28  ;;  %v3703_v28 = vadd.f32 %v8096_v1, %v8950_v34  ;;  %v4637_v37 = vmax.f32 %v3669_v62, 0.0 }
 0x187   : > { %7437 = vmatmul.msk.bf16.vlgmr.msra.gmra.mxu1 %vm4797_vm4, %v4671_v29  ;;  %5103 = vmatpush.bf16.msra.mxu0 %v5094_v3  ;;  %v3737_v29 = vadd.f32 %v8097_v2, %v8952_v13  ;;  %v7988_v3 = vld [vmem:[%s8263_s20 + $0xa0] sm:$0x30] }
 0x188   : > { %7442 = vmatmul.msk.bf16.vlgmr.msra.gmra.mxu2 %vm4797_vm4, %v4672_v17  ;;  %5127 = vmatpush.bf16.msra.mxu1 %v5118_v4  ;;  %v7515_v4 = vld [vmem:[%s8263_s20 + $0xa8] sm:$0xf]  ;;  %v7989_v17 = vld [vmem:[%s8263_s20 + $0xa8] sm:$0x30]  ;;  %v7511_v38 = vor.u32 %v7988_v3, %v7510_v32  ;;  %v4679_v26 = vpack.c.bf16 %v4637_v37, %v4637_v37  ;;  %v8103_v37 = vld [vmem:[%s8253_s29 + $0x15] ss:$0 sm:$0xff] }
 0x189   : > { %7447 = vmatmul.msk.bf16.vlgmr.msra.gmra.mxu3 %vm4797_vm4, %v4673_v7  ;;  %5151 = vmatpush.bf16.msra.mxu2 %v5142_v8  ;;  %v7520_v7 = vld [vmem:[%s8263_s20 + $0xb0] sm:$0xf]  ;;  %v7990_v8 = vld [vmem:[%s8263_s20 + $0xb0] sm:$0x30]  ;;  %v7516_v9 = vor.u32 %v7989_v17, %v7515_v4  ;;  %v4639_v63 = vmax.f32 %v3737_v29, 0.0 }
 0x18a   : > { %5175 = vmatpush.bf16.msra.mxu3 %v5166_v23  ;;  %v7525_v23 = vld [vmem:[%s8263_s20 + $0xb8] sm:$0xf]  ;;  %v7521_v57 = vor.u32 %v7990_v8, %v7520_v7  ;;  %v5286_v39 = vand.u32 %v7511_v38, %v8852_v21  ;;  %v8104_v38 = vld [vmem:[%s8253_s29 + $0x16] ss:$0 sm:$0xff] }
 0x18b   : > { %v8966_v30 = vpop.f32.mrf.mxu2  ;;  %v3704_v56 = vpop.f32.mrf.mxu0  ;;  %v5310_v40 = vand.u32 %v7516_v9, %v8852_v21  ;;  %v4681_v52 = vpack.c.bf16 %v4639_v63, %v4639_v63  ;;  %v8105_v9 = vld [vmem:[%s8253_s29 + $0x17] ss:$0 sm:$0xff] }
 0x18c   : > { %v8968_v41 = vpop.f32.mrf.mxu3  ;;  %v3738_v42 = vpop.f32.mrf.mxu1  ;;  %v7991_v56 = vld [vmem:[%s8263_s20 + $0xb8] sm:$0x30]  ;;  %v5334_v55 = vand.u32 %v7521_v57, %v8852_v21  ;;  %v3771_v15 = vadd.f32 %v8098_v35, %v8966_v30 }
 0x18d   : > { %v4638_v42 = vmax.f32 %v3703_v28, 0.0  ;;  %v7526_v43 = vor.u32 %v7991_v56, %v7525_v23 }
 0x18e   : > { %v4640_v49 = vmax.f32 %v3771_v15, 0.0 }
 0x18f   : > { %v4680_v51 = vpack.c.bf16 %v4638_v42, %v4638_v42  ;;  %v5358_v58 = vand.u32 %v7526_v43, %v8852_v21 }
 0x190   : > { %v4682_v28 = vpack.c.bf16 %v4640_v49, %v4640_v49  ;;  %v8106_v49 = vld [vmem:[%s8253_s29 + $0x18] ss:$0 sm:$0xff] }
 0x193   : > { %v3772_v33 = vpop.f32.mrf.mxu2  ;;  %v8982_v27 = vpop.f32.mrf.mxu0 }
 0x194   : > { %v3806_v14 = vpop.f32.mrf.mxu3  ;;  %v8984_v31 = vpop.f32.mrf.mxu1  ;;  %v3805_v33 = vadd.f32 %v8099_v36, %v8968_v41 }
 0x195   : > { %v7530_v14 = vld [vmem:[%s8263_s20 + $0xc0] sm:$0xf] }
 0x196   : > { %7452 = vmatmul.msk.bf16.vlgmr.msrb.gmra.mxu0 %vm4797_vm4, %v4674_v53  ;;  %v3839_v53 = vadd.f32 %v8100_v47, %v8982_v27  ;;  %v4641_v50 = vmax.f32 %v3805_v33, 0.0 }
 0x197   : > { %7457 = vmatmul.msk.bf16.vlgmr.msrb.gmra.mxu1 %vm4797_vm4, %v4675_v54  ;;  %5199 = vmatpush.bf16.msrb.mxu0 %v5190_v5  ;;  %v3873_v54 = vadd.f32 %v8101_v48, %v8984_v31  ;;  %v7992_v5 = vld [vmem:[%s8263_s20 + $0xc0] sm:$0x30] }
 0x198   : > { %7462 = vmatmul.msk.bf16.vlgmr.msrb.gmra.mxu2 %vm4797_vm4, %v4676_v44  ;;  %5223 = vmatpush.bf16.msrb.mxu1 %v5214_v6  ;;  %v7535_v6 = vld [vmem:[%s8263_s20 + $0xc8] sm:$0xf]  ;;  %v7993_v44 = vld [vmem:[%s8263_s20 + $0xc8] sm:$0x30]  ;;  %v7531_v1 = vor.u32 %v7992_v5, %v7530_v14  ;;  %v4683_v29 = vpack.c.bf16 %v4641_v50, %v4641_v50  ;;  %v8107_v50 = vld [vmem:[%s8253_s29 + $0x19] ss:$0 sm:$0xff] }
 0x199   : > { %7467 = vmatmul.msk.bf16.vlgmr.msrb.gmra.mxu3 %vm4797_vm4, %v4677_v59  ;;  %5247 = vmatpush.bf16.msrb.mxu2 %v5238_v11  ;;  %v7540_v59 = vld [vmem:[%s8263_s20 + $0xd0] sm:$0xf]  ;;  %v7994_v11 = vld [vmem:[%s8263_s20 + $0xd0] sm:$0x30]  ;;  %v7536_v2 = vor.u32 %v7993_v44, %v7535_v6  ;;  %v4643_v30 = vmax.f32 %v3873_v54, 0.0 }
 0x19a   : > { %5271 = vmatpush.bf16.msrb.mxu3 %v5262_v12  ;;  %v7545_v12 = vld [vmem:[%s8263_s20 + $0xd8] sm:$0xf]  ;;  %v7541_v18 = vor.u32 %v7994_v11, %v7540_v59  ;;  %v5382_v3 = vand.u32 %v7531_v1, %v8852_v21 }
 0x19b   : > { %v8998_v16 = vpop.f32.mrf.mxu2  ;;  %v3840_v10 = vpop.f32.mrf.mxu0  ;;  %v5406_v4 = vand.u32 %v7536_v2, %v8852_v21  ;;  %v4685_v7 = vpack.c.bf16 %v4643_v30, %v4643_v30  ;;  %v8108_v1 = vld [vmem:[%s8253_s29 + $0x1a] ss:$0 sm:$0xff]  ;;  %v8109_v2 = vld [vmem:[%s8253_s29 + $0x1b] ss:$0 sm:$0xff] }
 0x19c   : > { %v9000_v22 = vpop.f32.mrf.mxu3  ;;  %v3874_v61 = vpop.f32.mrf.mxu1  ;;  %v7995_v10 = vld [vmem:[%s8263_s20 + $0xd8] sm:$0x30]  ;;  %v5430_v8 = vand.u32 %v7541_v18, %v8852_v21  ;;  %v3907_v43 = vadd.f32 %v8102_v24, %v8998_v16 }
 0x19d   : > { %v4642_v61 = vmax.f32 %v3839_v53, 0.0  ;;  %v7546_v41 = vor.u32 %v7995_v10, %v7545_v12 }
 0x19e   : > { %v4644_v35 = vmax.f32 %v3907_v43, 0.0 }
 0x19f   : > { %v4684_v17 = vpack.c.bf16 %v4642_v61, %v4642_v61  ;;  %v5454_v23 = vand.u32 %v7546_v41, %v8852_v21 }
 0x1a0   : > { %v4686_v53 = vpack.c.bf16 %v4644_v35, %v4644_v35  ;;  %v8110_v35 = vld [vmem:[%s8253_s29 + $0x1c] ss:$0 sm:$0xff] }
 0x1a3   : > { %v3908_v45 = vpop.f32.mrf.mxu2  ;;  %v9014_v13 = vpop.f32.mrf.mxu0 }
 0x1a4   : > { %v3942_v34 = vpop.f32.mrf.mxu3  ;;  %v9016_v46 = vpop.f32.mrf.mxu1  ;;  %v3941_v45 = vadd.f32 %v8103_v37, %v9000_v22 }
 0x1a5   : > { %v7550_v34 = vld [vmem:[%s8263_s20 + $0xe0] sm:$0xf] }
 0x1a6   : > { %7472 = vmatmul.msk.bf16.vlgmr.msra.gmra.mxu0 %vm4797_vm4, %v4678_v25  ;;  %v3975_v25 = vadd.f32 %v8104_v38, %v9014_v13  ;;  %v4645_v36 = vmax.f32 %v3941_v45, 0.0 }
 0x1a7   : > { %7477 = vmatmul.msk.bf16.vlgmr.msra.gmra.mxu1 %vm4797_vm4, %v4679_v26  ;;  %5295 = vmatpush.bf16.msra.mxu0 %v5286_v39  ;;  %v4009_v26 = vadd.f32 %v8105_v9, %v9016_v46  ;;  %v7996_v39 = vld [vmem:[%s8263_s20 + $0xe0] sm:$0x30] }
 0x1a8   : > { %7482 = vmatmul.msk.bf16.vlgmr.msra.gmra.mxu2 %vm4797_vm4, %v4680_v51  ;;  %5319 = vmatpush.bf16.msra.mxu1 %v5310_v40  ;;  %v7555_v40 = vld [vmem:[%s8263_s20 + $0xe8] sm:$0xf]  ;;  %v7997_v51 = vld [vmem:[%s8263_s20 + $0xe8] sm:$0x30]  ;;  %v7551_v47 = vor.u32 %v7996_v39, %v7550_v34  ;;  %v4687_v54 = vpack.c.bf16 %v4645_v36, %v4645_v36  ;;  %v8111_v36 = vld [vmem:[%s8253_s29 + $0x1d] ss:$0 sm:$0xff] }
 0x1a9   : > { %7487 = vmatmul.msk.bf16.vlgmr.msra.gmra.mxu3 %vm4797_vm4, %v4681_v52  ;;  %5343 = vmatpush.bf16.msra.mxu2 %v5334_v55  ;;  %v7560_v52 = vld [vmem:[%s8263_s20 + $0xf0] sm:$0xf]  ;;  %v7998_v55 = vld [vmem:[%s8263_s20 + $0xf0] sm:$0x30]  ;;  %v7556_v48 = vor.u32 %v7997_v51, %v7555_v40  ;;  %v4647_v16 = vmax.f32 %v4009_v26, 0.0 }
 0x1aa   : > { %5367 = vmatpush.bf16.msra.mxu3 %v5358_v58  ;;  %v7565_v58 = vld [vmem:[%s8263_s20 + $0xf8] sm:$0xf]  ;;  %v7561_v15 = vor.u32 %v7998_v55, %v7560_v52  ;;  %v5478_v5 = vand.u32 %v7551_v47, %v8852_v21  ;;  %v8112_v47 = vld [vmem:[%s8253_s29 + $0x1e] ss:$0 sm:$0xff] }
 0x1ab   : > { %v9030_v19 = vpop.f32.mrf.mxu2  ;;  %v3976_v60 = vpop.f32.mrf.mxu0  ;;  %v5502_v6 = vand.u32 %v7556_v48, %v8852_v21  ;;  %v4689_v59 = vpack.c.bf16 %v4647_v16, %v4647_v16  ;;  %v8113_v48 = vld [vmem:[%s8253_s29 + $0x1f] ss:$0 sm:$0xff] }
 0x1ac   : > { %v9032_v0 = vpop.f32.mrf.mxu3  ;;  %v4010_v20 = vpop.f32.mrf.mxu1  ;;  %v7999_v60 = vld [vmem:[%s8263_s20 + $0xf8] sm:$0x30]  ;;  %v5526_v11 = vand.u32 %v7561_v15, %v8852_v21  ;;  %v4043_v41 = vadd.f32 %v8106_v49, %v9030_v19 }
 0x1ad   : > { %v4646_v20 = vmax.f32 %v3975_v25, 0.0  ;;  %v7566_v22 = vor.u32 %v7999_v60, %v7565_v58  ;;  %v8007_v49 = vld [vmem:[%s8263_s20 + $0x138] sm:$0x30] }
 0x1ae   : > { %v4648_v24 = vmax.f32 %v4043_v41, 0.0 }
 0x1af   : > { %v4688_v44 = vpack.c.bf16 %v4646_v20, %v4646_v20  ;;  %v5550_v12 = vand.u32 %v7566_v22, %v8852_v21 }
 0x1b0   : > { %v4690_v25 = vpack.c.bf16 %v4648_v24, %v4648_v24  ;;  %v8114_v24 = vld [vmem:[%s8253_s29 + $0x20] ss:$0 sm:$0xff] }
 0x1b3   : > { %v4044_v62 = vpop.f32.mrf.mxu2  ;;  %v9046_v31 = vpop.f32.mrf.mxu0 }
 0x1b4   : > { %v4078_v27 = vpop.f32.mrf.mxu3  ;;  %v9048_v32 = vpop.f32.mrf.mxu1  ;;  %v4077_v62 = vadd.f32 %v8107_v50, %v9032_v0 }
 0x1b5   : > { %v7570_v27 = vld [vmem:[%s8263_s20 + $0x100] sm:$0xf] }
 0x1b6   : > { %7492 = vmatmul.msk.bf16.vlgmr.msrb.gmra.mxu0 %vm4797_vm4, %v4682_v28  ;;  %v4111_v28 = vadd.f32 %v8108_v1, %v9046_v31  ;;  %v4649_v37 = vmax.f32 %v4077_v62, 0.0 }
 0x1b7   : > { %7497 = vmatmul.msk.bf16.vlgmr.msrb.gmra.mxu1 %vm4797_vm4, %v4683_v29  ;;  %5391 = vmatpush.bf16.msrb.mxu0 %v5382_v3  ;;  %v4145_v29 = vadd.f32 %v8109_v2, %v9048_v32  ;;  %v8000_v3 = vld [vmem:[%s8263_s20 + $0x100] sm:$0x30] }
 0x1b8   : > { %7502 = vmatmul.msk.bf16.vlgmr.msrb.gmra.mxu2 %vm4797_vm4, %v4684_v17  ;;  %5415 = vmatpush.bf16.msrb.mxu1 %v5406_v4  ;;  %v7575_v4 = vld [vmem:[%s8263_s20 + $0x108] sm:$0xf]  ;;  %v8001_v17 = vld [vmem:[%s8263_s20 + $0x108] sm:$0x30]  ;;  %v7571_v38 = vor.u32 %v8000_v3, %v7570_v27  ;;  %v4691_v26 = vpack.c.bf16 %v4649_v37, %v4649_v37  ;;  %v8115_v37 = vld [vmem:[%s8253_s29 + $0x21] ss:$0 sm:$0xff] }
 0x1b9   : > { %7507 = vmatmul.msk.bf16.vlgmr.msrb.gmra.mxu3 %vm4797_vm4, %v4685_v7  ;;  %5439 = vmatpush.bf16.msrb.mxu2 %v5430_v8  ;;  %v7580_v7 = vld [vmem:[%s8263_s20 + $0x110] sm:$0xf]  ;;  %v8002_v8 = vld [vmem:[%s8263_s20 + $0x110] sm:$0x30]  ;;  %v7576_v9 = vor.u32 %v8001_v17, %v7575_v4  ;;  %v4651_v19 = vmax.f32 %v4145_v29, 0.0 }
 0x1ba   : > { %5463 = vmatpush.bf16.msrb.mxu3 %v5454_v23  ;;  %v7585_v23 = vld [vmem:[%s8263_s20 + $0x118] sm:$0xf]  ;;  %v7581_v43 = vor.u32 %v8002_v8, %v7580_v7  ;;  %v5574_v39 = vand.u32 %v7571_v38, %v8852_v21  ;;  %v8116_v38 = vld [vmem:[%s8253_s29 + $0x22] ss:$0 sm:$0xff] }
 0x1bb   : > { %v9062_v56 = vpop.f32.mrf.mxu2  ;;  %v4112_v63 = vpop.f32.mrf.mxu0  ;;  %v5598_v40 = vand.u32 %v7576_v9, %v8852_v21  ;;  %v4693_v52 = vpack.c.bf16 %v4651_v19, %v4651_v19  ;;  %v8117_v9 = vld [vmem:[%s8253_s29 + $0x23] ss:$0 sm:$0xff] }
 0x1bc   : > { %v9064_v42 = vpop.f32.mrf.mxu3  ;;  %v4146_v57 = vpop.f32.mrf.mxu1  ;;  %v8003_v63 = vld [vmem:[%s8263_s20 + $0x118] sm:$0x30]  ;;  %v5622_v55 = vand.u32 %v7581_v43, %v8852_v21  ;;  %v4179_v22 = vadd.f32 %v8110_v35, %v9062_v56 }
 0x1bd   : > { %v4650_v57 = vmax.f32 %v4111_v28, 0.0  ;;  %v7586_v0 = vor.u32 %v8003_v63, %v7585_v23 }
 0x1be   : > { %v4652_v50 = vmax.f32 %v4179_v22, 0.0 }
 0x1bf   : > { %v4692_v51 = vpack.c.bf16 %v4650_v57, %v4650_v57  ;;  %v5646_v58 = vand.u32 %v7586_v0, %v8852_v21 }
 0x1c0   : > { %v4694_v28 = vpack.c.bf16 %v4652_v50, %v4652_v50 }
 0x1c3   : > { %v4180_v33 = vpop.f32.mrf.mxu2  ;;  %v9078_v46 = vpop.f32.mrf.mxu0 }
 0x1c4   : > { %v4214_v13 = vpop.f32.mrf.mxu3  ;;  %v9080_v14 = vpop.f32.mrf.mxu1  ;;  %v4213_v33 = vadd.f32 %v8111_v36, %v9064_v42 }
 0x1c5   : > { %v7590_v13 = vld [vmem:[%s8263_s20 + $0x120] sm:$0xf] }
 0x1c6   : > { %7512 = vmatmul.msk.bf16.vlgmr.msra.gmra.mxu0 %vm4797_vm4, %v4686_v53  ;;  %v4247_v53 = vadd.f32 %v8112_v47, %v9078_v46  ;;  %v4653_v1 = vmax.f32 %v4213_v33, 0.0 }
 0x1c7   : > { %7517 = vmatmul.msk.bf16.vlgmr.msra.gmra.mxu1 %vm4797_vm4, %v4687_v54  ;;  %5487 = vmatpush.bf16.msra.mxu0 %v5478_v5  ;;  %v4281_v54 = vadd.f32 %v8113_v48, %v9080_v14  ;;  %v8004_v5 = vld [vmem:[%s8263_s20 + $0x120] sm:$0x30] }
 0x1c8   : > { %7522 = vmatmul.msk.bf16.vlgmr.msra.gmra.mxu2 %vm4797_vm4, %v4688_v44  ;;  %5511 = vmatpush.bf16.msra.mxu1 %v5502_v6  ;;  %v7595_v6 = vld [vmem:[%s8263_s20 + $0x128] sm:$0xf]  ;;  %v8005_v44 = vld [vmem:[%s8263_s20 + $0x128] sm:$0x30]  ;;  %v7591_v2 = vor.u32 %v8004_v5, %v7590_v13  ;;  %v4695_v29 = vpack.c.bf16 %v4653_v1, %v4653_v1 }
 0x1c9   : > { %7527 = vmatmul.msk.bf16.vlgmr.msra.gmra.mxu3 %vm4797_vm4, %v4689_v59  ;;  %5535 = vmatpush.bf16.msra.mxu2 %v5526_v11  ;;  %v7600_v59 = vld [vmem:[%s8263_s20 + $0x130] sm:$0xf]  ;;  %v8006_v11 = vld [vmem:[%s8263_s20 + $0x130] sm:$0x30]  ;;  %v4655_v56 = vmax.f32 %v4281_v54, 0.0 }
 0x1ca   : > { %5559 = vmatpush.bf16.msra.mxu3 %v5550_v12  ;;  %v7605_v12 = vld [vmem:[%s8263_s20 + $0x138] sm:$0xf]  ;;  %v7601_v41 = vor.u32 %v8006_v11, %v7600_v59  ;;  %v5670_v3 = vand.u32 %v7591_v2, %v8852_v21  ;;  %v8120_v59 = vld [vmem:[%s8253_s29 + $0x26] ss:$0 sm:$0xff]  ;;  %v8121_v11 = vld [vmem:[%s8253_s29 + $0x27] ss:$0 sm:$0xff] }
 0x1cb   : > { %v9094_v10 = vpop.f32.mrf.mxu2  ;;  %v4248_v30 = vpop.f32.mrf.mxu0  ;;  %v7606_v42 = vor.u32 %v8007_v49, %v7605_v12  ;;  %v4697_v7 = vpack.c.bf16 %v4655_v56, %v4655_v56 }
 0x1cc   : > { %v9096_v61 = vpop.f32.mrf.mxu3  ;;  %v4282_v18 = vpop.f32.mrf.mxu1  ;;  %v7596_v30 = vor.u32 %v8005_v44, %v7595_v6  ;;  %v5718_v8 = vand.u32 %v7601_v41, %v8852_v21  ;;  %v4315_v19 = vadd.f32 %v8114_v24, %v9094_v10  ;;  %v8118_v6 = vld [vmem:[%s8253_s29 + $0x24] ss:$0 sm:$0xff]  ;;  %v8119_v44 = vld [vmem:[%s8253_s29 + $0x25] ss:$0 sm:$0xff] }
 0x1cd   : > { %v4654_v18 = vmax.f32 %v4247_v53, 0.0  ;;  %v5742_v23 = vand.u32 %v7606_v42, %v8852_v21  ;;  %v4349_v43 = vadd.f32 %v8115_v37, %v9096_v61 }
 0x1ce   : > { %v5694_v4 = vand.u32 %v7596_v30, %v8852_v21 }
 0x1cf   : > { %v4696_v17 = vpack.c.bf16 %v4654_v18, %v4654_v18 }
 0x1d3   : > { %v4316_v45 = vpop.f32.mrf.mxu2  ;;  %v9110_v32 = vpop.f32.mrf.mxu0 }
 0x1d4   : > { %v4350_v31 = vpop.f32.mrf.mxu3  ;;  %v9112_v34 = vpop.f32.mrf.mxu1 }
 0x1d5   : > { %v7610_v31 = vld [vmem:[%s8263_s20 + $0x140] sm:$0xf] }
 0x1d6   : > { %7532 = vmatmul.msk.bf16.vlgmr.msrb.gmra.mxu0 %vm4797_vm4, %v4690_v25  ;;  %v4383_v25 = vadd.f32 %v8116_v38, %v9110_v32 }
 0x1d7   : > { %7537 = vmatmul.msk.bf16.vlgmr.msrb.gmra.mxu1 %vm4797_vm4, %v4691_v26  ;;  %5583 = vmatpush.bf16.msrb.mxu0 %v5574_v39  ;;  %v4417_v26 = vadd.f32 %v8117_v9, %v9112_v34  ;;  %v8008_v39 = vld [vmem:[%s8263_s20 + $0x140] sm:$0x30]  ;;  %v8122_v9 = vld [vmem:[%s8253_s29 + $0x28] ss:$0 sm:$0xff] }
 0x1d8   : > { %7542 = vmatmul.msk.bf16.vlgmr.msrb.gmra.mxu2 %vm4797_vm4, %v4692_v51  ;;  %5607 = vmatpush.bf16.msrb.mxu1 %v5598_v40  ;;  %v7615_v40 = vld [vmem:[%s8263_s20 + $0x148] sm:$0xf]  ;;  %v8009_v51 = vld [vmem:[%s8263_s20 + $0x148] sm:$0x30]  ;;  %v4658_v36 = vmax.f32 %v4383_v25, 0.0 }
 0x1d9   : > { %7547 = vmatmul.msk.bf16.vlgmr.msrb.gmra.mxu3 %vm4797_vm4, %v4693_v52  ;;  %5631 = vmatpush.bf16.msrb.mxu2 %v5622_v55  ;;  %v4656_v52 = vmax.f32 %v4315_v19, 0.0  ;;  %v4657_v55 = vmax.f32 %v4349_v43, 0.0  ;;  %v7616_v35 = vor.u32 %v8009_v51, %v7615_v40  ;;  %v4659_v47 = vmax.f32 %v4417_v26, 0.0  ;;  %v8123_v19 = vld [vmem:[%s8253_s29 + $0x29] ss:$0 sm:$0xff] }
 0x1da   : > { %5655 = vmatpush.bf16.msrb.mxu3 %v5646_v58  ;;  %v7611_v58 = vor.u32 %v8008_v39, %v7610_v31  ;;  %v4700_v53 = vpack.c.bf16 %v4658_v36, %v4658_v36 }
 0x1db   : > { %v9126_v60 = vpop.f32.mrf.mxu2  ;;  %v4384_v16 = vpop.f32.mrf.mxu0  ;;  %v4698_v61 = vpack.c.bf16 %v4656_v52, %v4656_v52  ;;  %v5790_v13 = vand.u32 %v7616_v35, %v8852_v21  ;;  %v4701_v54 = vpack.c.bf16 %v4659_v47, %v4659_v47 }
 0x1dc   : > { %v9128_v20 = vpop.f32.mrf.mxu3  ;;  %v4418_v15 = vpop.f32.mrf.mxu1  ;;  %v4699_v16 = vpack.c.bf16 %v4657_v55, %v4657_v55  ;;  %v5766_v33 = vand.u32 %v7611_v58, %v8852_v21  ;;  %v4451_v2 = vadd.f32 %v8118_v6, %v9126_v60 }
 0x1dd   : > { %v4485_v30 = vadd.f32 %v8119_v44, %v9128_v20 }
 0x1e3   : > { %v4452_v46 = vpop.f32.mrf.mxu2  ;;  %v9142_v14 = vpop.f32.mrf.mxu0 }
 0x1e4   : > { %v4486_v62 = vpop.f32.mrf.mxu3  ;;  %v9144_v27 = vpop.f32.mrf.mxu1  ;;  %v4519_v56 = vadd.f32 %v8120_v59, %v9142_v14 }
 0x1e5   : > { %v4553_v41 = vadd.f32 %v8121_v11, %v9144_v27  ;;  %v4660_v62 = vmax.f32 %v4451_v2, 0.0 }
 0x1e6   : > { %7552 = vmatmul.msk.bf16.vlgmr.msra.gmra.mxu0 %vm4797_vm4, %v4694_v28  ;;  %v4661_v28 = vmax.f32 %v4485_v30, 0.0 }
 0x1e7   : > { %7557 = vmatmul.msk.bf16.vlgmr.msra.gmra.mxu1 %vm4797_vm4, %v4695_v29  ;;  %5679 = vmatpush.bf16.msra.mxu0 %v5670_v3  ;;  %v4662_v29 = vmax.f32 %v4519_v56, 0.0  ;;  %v4663_v3 = vmax.f32 %v4553_v41, 0.0 }
 0x1e8   : > { %7562 = vmatmul.msk.bf16.vlgmr.msra.gmra.mxu2 %vm4797_vm4, %v4696_v17  ;;  %5703 = vmatpush.bf16.msra.mxu1 %v5694_v4  ;;  %v4703_v20 = vpack.c.bf16 %v4661_v28, %v4661_v28 }
 0x1e9   : > { %7567 = vmatmul.msk.bf16.vlgmr.msra.gmra.mxu3 %vm4797_vm4, %v4697_v7  ;;  %5727 = vmatpush.bf16.msra.mxu2 %v5718_v8  ;;  %v4702_v8 = vpack.c.bf16 %v4660_v62, %v4660_v62  ;;  %v4704_v14 = vpack.c.bf16 %v4662_v29, %v4662_v29  ;;  %v4705_v24 = vpack.c.bf16 %v4663_v3, %v4663_v3 }
 0x1ea   : > { %5751 = vmatpush.bf16.msra.mxu3 %v5742_v23 }
 0x1eb   : > { %v9158_v63 = vpop.f32.mrf.mxu2  ;;  %v4520_v0 = vpop.f32.mrf.mxu0 }
 0x1ec   : > { %v9160_v57 = vpop.f32.mrf.mxu3  ;;  %v4554_v45 = vpop.f32.mrf.mxu1  ;;  %v4587_v26 = vadd.f32 %v8122_v9, %v9158_v63 }
 0x1ed   : > { %v4621_v39 = vadd.f32 %v8123_v19, %v9160_v57 }
 0x1ee   : > { %v4664_v55 = vmax.f32 %v4587_v26, 0.0 }
 0x1ef   : > { %v4665_v58 = vmax.f32 %v4621_v39, 0.0 }
 0x1f3   : > { %v4588_v10 = vpop.f32.mrf.mxu2  ;;  %v4817_v15 = vpop.f32.mrf.mxu0 }
 0x1f4   : > { %v4622_v48 = vpop.f32.mrf.mxu3  ;;  %v4841_v32 = vpop.f32.mrf.mxu1  ;;  %v5807_v34 = vsel %vm5806_vm5, %v4817_v15, 0.0 }
 0x1f5   : > { %v5808_v22 = vsel %vm5806_vm5, %v4841_v32, 0.0  ;;  %v4706_v48 = vpack.c.bf16 %v4664_v55, %v4664_v55 }
 0x1f6   : > { %v5809_v5 = vadd.f32 %v5808_v22, %v5807_v34  ;;  %7572 = vmatmul.msk.bf16.vlgmr.msrb.gmra.mxu0 %vm4797_vm4, %v4698_v61  ;;  %v4707_v61 = vpack.c.bf16 %v4665_v58, %v4665_v58 }
 0x1f7   : > { %7577 = vmatmul.msk.bf16.vlgmr.msrb.gmra.mxu1 %vm4797_vm4, %v4699_v16  ;;  %5775 = vmatpush.bf16.msrb.mxu0 %v5766_v33 }
 0x1f8   : > { %7582 = vmatmul.msk.bf16.vlgmr.msrb.gmra.mxu2 %vm4797_vm4, %v4700_v53  ;;  %5799 = vmatpush.bf16.msrb.mxu1 %v5790_v13 }
 0x1f9   : > { %7587 = vmatmul.msk.bf16.vlgmr.msrb.gmra.mxu3 %vm4797_vm4, %v4701_v54 }
 0x1fb   : > { %v4865_v12 = vpop.f32.mrf.mxu2  ;;  %v4819_v50 = vpop.f32.mrf.mxu0 }
 0x1fc   : > { %v4889_v49 = vpop.f32.mrf.mxu3  ;;  %v5810_v21 = vsel %vm5806_vm5, %v4865_v12, 0.0  ;;  %v4843_v1 = vpop.f32.mrf.mxu1 }
 0x1fd   : > { %v5811_v18 = vadd.f32 %v5810_v21, %v5809_v5  ;;  %v5812_v42 = vsel %vm5806_vm5, %v4889_v49, 0.0 }
 0x1ff   : > { %v5813_v46 = vadd.f32 %v5812_v42, %v5811_v18 }
 0x203   : > { %v4867_v4 = vpop.f32.mrf.mxu2  ;;  %v4913_v7 = vpop.f32.mrf.mxu0 }
 0x204   : > { %v4891_v17 = vpop.f32.mrf.mxu3  ;;  %v4937_v60 = vpop.f32.mrf.mxu1  ;;  %v5814_v23 = vsel %vm5806_vm5, %v4913_v7, 0.0 }
 0x205   : > { %v5815_v27 = vadd.f32 %v5814_v23, %v5813_v46  ;;  %v5816_v37 = vsel %vm5806_vm5, %v4937_v60, 0.0 }
 0x206   : > { %7592 = vmatmul.msk.bf16.vlgmr.msra.gmra.mxu0 %vm4797_vm4, %v4702_v8 }
 0x207   : > { %7597 = vmatmul.msk.bf16.vlgmr.msra.gmra.mxu1 %vm4797_vm4, %v4703_v20  ;;  %v5817_v38 = vadd.f32 %v5816_v37, %v5815_v27 }
 0x208   : > { %7602 = vmatmul.msk.bf16.vlgmr.msra.gmra.mxu2 %vm4797_vm4, %v4704_v14 }
 0x209   : > { %7607 = vmatmul.msk.bf16.vlgmr.msra.gmra.mxu3 %vm4797_vm4, %v4705_v24 }
 0x20b   : > { %v4961_v43 = vpop.f32.mrf.mxu2  ;;  %v4915_v31 = vpop.f32.mrf.mxu0 }
 0x20c   : > { %v4985_v0 = vpop.f32.mrf.mxu3  ;;  %v5818_v45 = vsel %vm5806_vm5, %v4961_v43, 0.0  ;;  %v4939_v25 = vpop.f32.mrf.mxu1 }
 0x20d   : > { %v5819_v40 = vadd.f32 %v5818_v45, %v5817_v38  ;;  %v5820_v51 = vsel %vm5806_vm5, %v4985_v0, 0.0 }
 0x20f   : > { %v5821_v52 = vadd.f32 %v5820_v51, %v5819_v40 }
 0x213   : > { %v4963_v35 = vpop.f32.mrf.mxu2  ;;  %v5009_v47 = vpop.f32.mrf.mxu0 }
 0x214   : > { %v4987_v36 = vpop.f32.mrf.mxu3  ;;  %v5033_v10 = vpop.f32.mrf.mxu1  ;;  %v5822_v16 = vsel %vm5806_vm5, %v5009_v47, 0.0 }
 0x215   : > { %v5823_v15 = vadd.f32 %v5822_v16, %v5821_v52  ;;  %v5824_v32 = vsel %vm5806_vm5, %v5033_v10, 0.0 }
 0x216   : > { %7612 = vmatmul.msk.bf16.vlgmr.msrb.gmra.mxu0 %vm4797_vm4, %v4706_v48 }
 0x217   : > { %7617 = vmatmul.msk.bf16.vlgmr.msrb.gmra.mxu1 %vm4797_vm4, %v4707_v61  ;;  %v5825_v63 = vadd.f32 %v5824_v32, %v5823_v15 }
 0x21b   : > { %v5057_v57 = vpop.f32.mrf.mxu2  ;;  %v5011_v22 = vpop.f32.mrf.mxu0 }
 0x21c   : > { %v5081_v34 = vpop.f32.mrf.mxu3  ;;  %v5035_v33 = vpop.f32.mrf.mxu1  ;;  %v5826_v1 = vsel %vm5806_vm5, %v5057_v57, 0.0 }
 0x21d   : > { %v5827_v18 = vadd.f32 %v5826_v1, %v5825_v63  ;;  %v5828_v42 = vsel %vm5806_vm5, %v5081_v34, 0.0 }
 0x21f   : > { %v5829_v62 = vadd.f32 %v5828_v42, %v5827_v18 }
 0x223   : > { %v5059_v13 = vpop.f32.mrf.mxu2  ;;  %v5105_v54 = vpop.f32.mrf.mxu0 }
 0x224   : > { %v5083_v53 = vpop.f32.mrf.mxu3  ;;  %v5129_v5 = vpop.f32.mrf.mxu1  ;;  %v5830_v46 = vsel %vm5806_vm5, %v5105_v54, 0.0 }
 0x225   : > { %v5831_v28 = vadd.f32 %v5830_v46, %v5829_v62  ;;  %v5832_v7 = vsel %vm5806_vm5, %v5129_v5, 0.0 }
 0x227   : > { %v5833_v8 = vadd.f32 %v5832_v7, %v5831_v28 }
 0x22b   : > { %v5153_v6 = vpop.f32.mrf.mxu2  ;;  %v5107_v59 = vpop.f32.mrf.mxu0 }
 0x22c   : > { %v5177_v44 = vpop.f32.mrf.mxu3  ;;  %v5131_v11 = vpop.f32.mrf.mxu1  ;;  %v5834_v60 = vsel %vm5806_vm5, %v5153_v6, 0.0 }
 0x22d   : > { %v5835_v20 = vadd.f32 %v5834_v60, %v5833_v8  ;;  %v5836_v23 = vsel %vm5806_vm5, %v5177_v44, 0.0 }
 0x22f   : > { %v5837_v37 = vadd.f32 %v5836_v23, %v5835_v20 }
 0x233   : > { %v5155_v12 = vpop.f32.mrf.mxu2  ;;  %v5201_v21 = vpop.f32.mrf.mxu0 }
 0x234   : > { %v5179_v49 = vpop.f32.mrf.mxu3  ;;  %v5225_v50 = vpop.f32.mrf.mxu1  ;;  %v5838_v14 = vsel %vm5806_vm5, %v5201_v21, 0.0 }
 0x235   : > { %v5839_v19 = vadd.f32 %v5838_v14, %v5837_v37  ;;  %v5840_v43 = vsel %vm5806_vm5, %v5225_v50, 0.0 }
 0x237   : > { %v5841_v45 = vadd.f32 %v5840_v43, %v5839_v19 }
 0x23b   : > { %v5249_v2 = vpop.f32.mrf.mxu2  ;;  %v5203_v56 = vpop.f32.mrf.mxu0 }
 0x23c   : > { %v5273_v30 = vpop.f32.mrf.mxu3  ;;  %v5227_v41 = vpop.f32.mrf.mxu1  ;;  %v5842_v0 = vsel %vm5806_vm5, %v5249_v2, 0.0 }
 0x23d   : > { %v5843_v26 = vadd.f32 %v5842_v0, %v5841_v45  ;;  %v5844_v51 = vsel %vm5806_vm5, %v5273_v30, 0.0 }
 0x23f   : > { %v5845_v55 = vadd.f32 %v5844_v51, %v5843_v26 }
 0x243   : > { %v5251_v29 = vpop.f32.mrf.mxu2  ;;  %v5297_v4 = vpop.f32.mrf.mxu0 }
 0x244   : > { %v5275_v3 = vpop.f32.mrf.mxu3  ;;  %v5321_v17 = vpop.f32.mrf.mxu1  ;;  %v5846_v52 = vsel %vm5806_vm5, %v5297_v4, 0.0 }
 0x245   : > { %v5847_v58 = vadd.f32 %v5846_v52, %v5845_v55  ;;  %v5848_v48 = vsel %vm5806_vm5, %v5321_v17, 0.0 }
 0x247   : > { %v5849_v16 = vadd.f32 %v5848_v48, %v5847_v58 }
 0x24b   : > { %v5345_v24 = vpop.f32.mrf.mxu2  ;;  %v5299_v38 = vpop.f32.mrf.mxu0 }
 0x24c   : > { %v5369_v27 = vpop.f32.mrf.mxu3  ;;  %v5323_v9 = vpop.f32.mrf.mxu1  ;;  %v5850_v61 = vsel %vm5806_vm5, %v5345_v24, 0.0 }
 0x24d   : > { %v5851_v15 = vadd.f32 %v5850_v61, %v5849_v16  ;;  %v5852_v32 = vsel %vm5806_vm5, %v5369_v27, 0.0 }
 0x24f   : > { %v5853_v22 = vadd.f32 %v5852_v32, %v5851_v15  ;;  %v5805_v32 = vld [vmem:[#allocation2] sm:$0x3] }
 0x253   : > { %v5347_v31 = vpop.f32.mrf.mxu2  ;;  %v5393_v39 = vpop.f32.mrf.mxu0 }
 0x254   : > { %v5371_v25 = vpop.f32.mrf.mxu3  ;;  %v5417_v40 = vpop.f32.mrf.mxu1  ;;  %v5854_v63 = vsel %vm5806_vm5, %v5393_v39, 0.0 }
 0x255   : > { %v5855_v53 = vadd.f32 %v5854_v63, %v5853_v22  ;;  %v5856_v54 = vsel %vm5806_vm5, %v5417_v40, 0.0 }
 0x257   : > { %v5857_v6 = vadd.f32 %v5856_v54, %v5855_v53 }
 0x25b   : > { %v5441_v35 = vpop.f32.mrf.mxu2  ;;  %v5395_v47 = vpop.f32.mrf.mxu0 }
 0x25c   : > { %v5465_v36 = vpop.f32.mrf.mxu3  ;;  %v5419_v10 = vpop.f32.mrf.mxu1  ;;  %v5858_v5 = vsel %vm5806_vm5, %v5441_v35, 0.0 }
 0x25d   : > { %v5859_v11 = vadd.f32 %v5858_v5, %v5857_v6  ;;  %v5860_v21 = vsel %vm5806_vm5, %v5465_v36, 0.0 }
 0x25f   : > { %v5861_v1 = vadd.f32 %v5860_v21, %v5859_v11 }
 0x263   : > { %v5443_v57 = vpop.f32.mrf.mxu2  ;;  %v5489_v33 = vpop.f32.mrf.mxu0 }
 0x264   : > { %v5467_v34 = vpop.f32.mrf.mxu3  ;;  %v5513_v13 = vpop.f32.mrf.mxu1  ;;  %v5862_v50 = vsel %vm5806_vm5, %v5489_v33, 0.0 }
 0x265   : > { %v5863_v2 = vadd.f32 %v5862_v50, %v5861_v1  ;;  %v5864_v42 = vsel %vm5806_vm5, %v5513_v13, 0.0 }
 0x267   : > { %v5865_v62 = vadd.f32 %v5864_v42, %v5863_v2 }
 0x26b   : > { %v5537_v44 = vpop.f32.mrf.mxu2  ;;  %v5491_v12 = vpop.f32.mrf.mxu0 }
 0x26c   : > { %v5561_v59 = vpop.f32.mrf.mxu3  ;;  %v5515_v49 = vpop.f32.mrf.mxu1  ;;  %v5866_v46 = vsel %vm5806_vm5, %v5537_v44, 0.0 }
 0x26d   : > { %v5867_v28 = vadd.f32 %v5866_v46, %v5865_v62  ;;  %v5868_v29 = vsel %vm5806_vm5, %v5561_v59, 0.0 }
 0x26f   : > { %v5869_v7 = vadd.f32 %v5868_v29, %v5867_v28 }
 0x273   : > { %v5539_v30 = vpop.f32.mrf.mxu2  ;;  %v5585_v56 = vpop.f32.mrf.mxu0 }
 0x274   : > { %v5563_v18 = vpop.f32.mrf.mxu3  ;;  %v5609_v41 = vpop.f32.mrf.mxu1  ;;  %v5870_v3 = vsel %vm5806_vm5, %v5585_v56, 0.0 }
 0x275   : > { %v5871_v20 = vadd.f32 %v5870_v3, %v5869_v7  ;;  %v5872_v23 = vsel %vm5806_vm5, %v5609_v41, 0.0 }
 0x277   : > { %v5873_v24 = vadd.f32 %v5872_v23, %v5871_v20 }
 0x27b   : > { %v5633_v4 = vpop.f32.mrf.mxu2  ;;  %v5587_v60 = vpop.f32.mrf.mxu0 }
 0x27c   : > { %v5657_v17 = vpop.f32.mrf.mxu3  ;;  %v5611_v8 = vpop.f32.mrf.mxu1  ;;  %v5874_v14 = vsel %vm5806_vm5, %v5633_v4, 0.0 }
 0x27d   : > { %v5875_v38 = vadd.f32 %v5874_v14, %v5873_v24  ;;  %v5876_v43 = vsel %vm5806_vm5, %v5657_v17, 0.0 }
 0x27f   : > { %v5877_v45 = vadd.f32 %v5876_v43, %v5875_v38 }
 0x283   : > { %v5635_v27 = vpop.f32.mrf.mxu2  ;;  %v5681_v9 = vpop.f32.mrf.mxu0 }
 0x284   : > { %v5659_v37 = vpop.f32.mrf.mxu3  ;;  %v5705_v19 = vpop.f32.mrf.mxu1  ;;  %v5878_v0 = vsel %vm5806_vm5, %v5681_v9, 0.0 }
 0x285   : > { %v5879_v31 = vadd.f32 %v5878_v0, %v5877_v45  ;;  %v5880_v51 = vsel %vm5806_vm5, %v5705_v19, 0.0 }
 0x287   : > { %v5881_v55 = vadd.f32 %v5880_v51, %v5879_v31 }
 0x28b   : > { %v5729_v25 = vpop.f32.mrf.mxu2  ;;  %v5683_v39 = vpop.f32.mrf.mxu0 }
 0x28c   : > { %v5753_v26 = vpop.f32.mrf.mxu3  ;;  %v5707_v40 = vpop.f32.mrf.mxu1  ;;  %v5882_v52 = vsel %vm5806_vm5, %v5729_v25, 0.0 }
 0x28d   : > { %v5883_v58 = vadd.f32 %v5882_v52, %v5881_v55  ;;  %v5884_v35 = vsel %vm5806_vm5, %v5753_v26, 0.0 }
 0x28f   : > { %v5885_v10 = vadd.f32 %v5884_v35, %v5883_v58 }
 0x293   : > { %v5731_v36 = vpop.f32.mrf.mxu2  ;;  %v5777_v48 = vpop.f32.mrf.mxu0 }
 0x294   : > { %v5755_v47 = vpop.f32.mrf.mxu3  ;;  %v5801_v61 = vpop.f32.mrf.mxu1  ;;  %v5886_v16 = vsel %vm5806_vm5, %v5777_v48, 0.0 }
 0x295   : > { %v5887_v15 = vadd.f32 %v5886_v16, %v5885_v10  ;;  %v5888_v63 = vsel %vm5806_vm5, %v5801_v61, 0.0 }
 0x297   : > { %v5889_v57 = vadd.f32 %v5888_v63, %v5887_v15 }
 0x298   : > { %5895 = sbr.rel (%p7618_p5) target bundleno = 967 (0x3c7), region = 68 }
 0x299   : > { %v5890_v34 = vadd.f32 %v5889_v57, %v5805_v32 }
 0x29b   : > { %5891 = vst [vmem:[#allocation2] sm:$0x3] %v5890_v34  ;;  %v5779_v22 = vpop.f32.mrf.mxu0 }
 0x29c   : > { %v5803_v33 = vpop.f32.mrf.mxu1 }
 0x29d   : > { %v8017_v13 = vld [vmem:[%s9294_s7 + $0x38] sm:$0xff]  ;;  %v8016_v53 = vld [vmem:[%s9294_s7 + $0x30] sm:$0xff]  ;;  %v8015_v6 = vld [vmem:[%s9294_s7 + $0x28] sm:$0xff]  ;;  %vm6037_vm6 = vcmask 41984  }
 0x29e   : > { %5972 = vmatpush.bf16.msra.mxu0 %v8017_v13  ;;  %v8021_v54 = vld [vmem:[%s9296_s9 + $0x18] sm:$0xff]  ;;  %v8020_v5 = vld [vmem:[%s9296_s9 + $0x10] sm:$0xff]  ;;  %v8014_v44 = vld [vmem:[%s9294_s7 + $0x20] sm:$0xff] }
 0x29f   : > { %6026 = vmatpush.bf16.msra.mxu1 %v8021_v54  ;;  %v8013_v59 = vld [vmem:[%s9294_s7 + $0x18] sm:$0xff]  ;;  %v8124_v11 = vld [vmem:[%s9293_s6] ss:$0 sm:$0xff]  ;;  %v8012_v12 = vld [vmem:[%s9294_s7 + $0x10] sm:$0xff] }
 0x2a0   : > { %v8011_v50 = vld [vmem:[%s9294_s7 + $0x8] sm:$0xff]  ;;  %v8010_v2 = vld [vmem:[%s9294_s7] sm:$0xff] }
 0x2a1   : > { %v8019_v18 = vld [vmem:[%s9296_s9 + $0x8] sm:$0xff]  ;;  %v8018_v56 = vld [vmem:[%s9296_s9] sm:$0xff] }
 0x2a2   : > { %5973 = vmatpush.bf16.msra.mxu0 %v8016_v53  ;;  %v5896_v49 = vld [vmem:[#allocation2] sm:$0x3] }
 0x2a3   : > { %6027 = vmatpush.bf16.msra.mxu1 %v8020_v5  ;;  %v5901_v21 = vadd.f32 %v8124_v11, %v5896_v49  ;;  %v8125_v41 = vld [vmem:[%s9295_s8] ss:$0 sm:$0xff] }
 0x2a5   : > { %v5902_v1 = vmax.f32 %v5901_v21, 0.0 }
 0x2a6   : > { %5974 = vmatpush.bf16.msra.mxu0 %v8015_v6 }
 0x2a7   : > { %v5903_v30 = vpack.c.bf16 %v5902_v1, %v5902_v1  ;;  %6028 = vmatpush.bf16.msra.mxu1 %v8019_v18 }
 0x2aa   : > { %5975 = vmatpush.bf16.msra.mxu0 %v8014_v44 }
 0x2ab   : > { %6029 = vmatpush.bf16.msra.mxu1 %v8018_v56 }
 0x2ae   : > { %5976 = vmatpush.bf16.msra.mxu0 %v8013_v59 }
 0x2b2   : > { %5977 = vmatpush.bf16.msra.mxu0 %v8012_v12 }
 0x2b6   : > { %5978 = vmatpush.bf16.msra.mxu0 %v8011_v50 }
 0x2ba   : > { %5979 = vmatpush.bf16.msra.mxu0 %v8010_v2 }
 0x2bd   : > { %5980 = vmatmul.bf16.vlgmr.msra.gmra.mxu0 %v5903_v30 }
 0x33a   : > { %v5981_v42 = vpop.f32.mrf.mxu0 }
 0x33b   : > { %v5982_v46 = vadd.f32 %v8125_v41, %v5981_v42 }
 0x33d   : > { %v5985_v62 = vmax.f32 %v5982_v46, 0.0 }
 0x33f   : > { %v5986_v28 = vpack.c.bf16 %v5985_v62, %v5985_v62 }
 0x341   : > { %7667 = vmatmul.msk.bf16.vlgmr.msra.gmra.mxu1 %vm1034_vm0, %v5986_v28 }
 0x342   : > { %v5983_v29 = vpop.f32.mrf.mxu0 }
 0x3be   : > { %v6031_v3 = vpop.f32.mrf.mxu1 }
 0x3bf   : > { %v6035_v4 = vmax.f32 %v6031_v3, 0.0 }
 0x3c1   : > { %v6036_v17 = vmin.f32 %v6035_v4, 6.0 }
 0x3c3   : > { %6038 = vst.msk [vmem:[#allocation3] sm:$0x3] %vm6037_vm6, %v6036_v17 }
 0x3c6   : > { %v6033_v7 = vpop.f32.mrf.mxu1 }
 0x3c7 PF: > { %p8027_p6 = scmp.eq.s32.totalorder %s8230_s14, 1  ;;  %s8168_s29 = smov [#allocation3]  }
 0x3c8   : > { %s6045_s30 = sshll.u32 %s8168_s29, 4  ;;  %s6047_s16 = sshll.u32 %s9297_s10, 4  ;;  %s6046_s30 = int_to_ptr.vmem [resolvable:$true] %s6045_s30  ;;  %s6048_s16 = int_to_ptr.hbm [resolvable:$true] %s6047_s16 }
 0x3c9   : > { %8024 = dma.vmem_to_hbm [thread:$0]  (%p8027_p6), %s6046_s30, 32, %s6048_s16, [#allocation4]  }
 0x3ca   : > { %8159 = dma.done.wait (%p8027_p6), [#allocation4], 32  }
 0x3cb   : > { %8161 = vsyncadd (%p8027_p6), [#allocation4], 4294967264 }
 0x3cc PF: > { %s21_s13 = sadd.s32 1, %s8164_s13  }
 0x3cd   : > { %p18_p7 = scmp.ge.s32.totalorder %s21_s13, 4  }
 0x3cf   :  { %20 = sbr.rel (!%p18_p7) target bundleno = 1 (0x1), region = 110 }
 0x3d4   :  { %6061 = vsyncpa [#allocation4], 1 }
 0x3d5   :  { %6063 = vsyncpa [#allocation4 + $0x1], 1 }

</bundles_post_ra>
